<compile_context>
chip_gen: v6e
topology: v6e:2x2x1
jax: 0.10.0
libtpu: 0.0.40
codegen_flags: <defaults>
</compile_context>

<pallas_src>
import jax
import jax.numpy as jnp
import numpy as np
from jax.experimental import pallas as pl
from jax.experimental.pallas import tpu as pltpu


# ----------------------------------------------------------------------------
# Host-side constant construction (exact, float32).
# ----------------------------------------------------------------------------
def _bilinear_matrix(n_in, n_out):
    """1-D interpolation matrix for bilinear resize with align_corners=True."""
    m = np.zeros((n_out, n_in), dtype=np.float32)
    if n_in == 1:
        m[:, 0] = 1.0
        return m
    scale = (n_in - 1) / (n_out - 1)
    for i in range(n_out):
        src = i * scale
        i0 = min(int(np.floor(src)), n_in - 1)
        i1 = min(i0 + 1, n_in - 1)
        w1 = src - i0
        m[i, i0] += 1.0 - w1
        m[i, i1] += w1
    return m


def _upsample_kron(H, W):
    """(H*W, 2H*2W) matrix U so that x_flat @ U is the 2x bilinear upsample."""
    uh = _bilinear_matrix(H, 2 * H)          # (Ho, H)
    uw = _bilinear_matrix(W, 2 * W)          # (Wo, W)
    # kron(uh, uw)[Y*Wo+X, h*W+w] = uh[Y,h] * uw[X,w]
    return jnp.asarray(np.kron(uh, uw).T)    # (H*W, Ho*Wo)


def _tap_masks(Ho, Wo):
    """(9, 1, Ho*Wo) 0/1 masks: validity of the (dy,dx)-shifted pixel (zero padding)."""
    p = np.arange(Ho * Wo)
    Y, X = p // Wo, p % Wo
    m = np.zeros((9, 1, Ho * Wo), np.float32)
    for k in range(9):
        dy, dx = k // 3 - 1, k % 3 - 1
        valid = (Y + dy >= 0) & (Y + dy < Ho) & (X + dx >= 0) & (X + dx < Wo)
        m[k, 0] = valid.astype(np.float32)
    return jnp.asarray(m)


# ----------------------------------------------------------------------------
# Fused up-stage: bilinear 2x upsample + (conv3x3 -> folded BN -> ReLU) x 2.
# ----------------------------------------------------------------------------
def up_forward(x, w1, s1, b1, w2, s2, b2, *, compute_dtype=jnp.float32):
    """x: (B, Cin, H, W) NCHW.  w*: (9, Cout, Cin_layer) with tap k = ky*3+kx.
    s*/b*: (Cout, 1) folded BatchNorm scale/bias.  Returns (B, Cout, 2H, 2W) NCHW.
    Set compute_dtype=jnp.bfloat16 on v6e/v7x for the fast MXU path."""
    B, Cin, H, W = x.shape
    Ho, Wo = 2 * H, 2 * W
    n_out = Ho * Wo
    Cout = w1.shape[1]
    assert w1.shape == (9, Cout, Cin) and w2.shape == (9, Cout, Cout)
    assert s1.shape == (Cout, 1) and b1.shape == (Cout, 1)

    U = _upsample_kron(H, W).astype(compute_dtype)        # (H*W, Ho*Wo)
    masks = _tap_masks(Ho, Wo).astype(compute_dtype)      # (9, 1, Ho*Wo)
    offs = [(k // 3 - 1) * Wo + (k % 3 - 1) for k in range(9)]

    xf = x.reshape(B, Cin, H * W).astype(compute_dtype)   # free XLA reshape, NCHW order
    w1c = w1.astype(compute_dtype)
    w2c = w2.astype(compute_dtype)

    def kernel(x_ref, u_ref, m_ref, w1_ref, s1_ref, b1_ref,
               w2_ref, s2_ref, b2_ref, o_ref):
        # 1) bilinear 2x upsample: single lane-dense MXU matmul (C, H*W)@(H*W, Ho*Wo).
        xu = jnp.dot(x_ref[0], u_ref[...], preferred_element_type=jnp.float32)

        def conv3x3_bn_relu(act, w_ref, s_ref, b_ref):
            # 3x3 conv (padding=1) as 9 shifted matmuls accumulated in f32.
            act_c = act.astype(w_ref.dtype)
            acc = jnp.zeros((Cout, n_out), jnp.float32)
            for k, off in enumerate(offs):
                if off == 0:
                    shifted = act_c                               # center tap
                else:
                    # out[p] = act[p + off] with zero fill: static lane roll + mask.
                    shifted = jnp.roll(act_c, -off, axis=1) * m_ref[k]
                acc = acc + jnp.dot(w_ref[k], shifted,
                                    preferred_element_type=jnp.float32)
            # folded BN affine + ReLU (f32).
            return jnp.maximum(acc * s_ref[...] + b_ref[...], 0.0)

        y = conv3x3_bn_relu(xu, w1_ref, s1_ref, b1_ref)
        y = conv3x3_bn_relu(y, w2_ref, s2_ref, b2_ref)
        o_ref[0] = y.astype(o_ref.dtype)                   # lane-dense (Cout, Ho*Wo) store

    out = pl.pallas_call(
        kernel,
        out_shape=jax.ShapeDtypeStruct((B, Cout, n_out), jnp.float32),
        grid=(B,),
        in_specs=[
            pl.BlockSpec((1, Cin, H * W), lambda b: (b, 0, 0)),   # activations
            pl.BlockSpec((H * W, n_out), lambda b: (0, 0)),       # upsample matrix
            pl.BlockSpec((9, 1, n_out), lambda b: (0, 0, 0)),     # border masks
            pl.BlockSpec((9, Cout, Cin), lambda b: (0, 0, 0)),    # conv1 weights
            pl.BlockSpec((Cout, 1), lambda b: (0, 0)),            # bn1 scale
            pl.BlockSpec((Cout, 1), lambda b: (0, 0)),            # bn1 bias
            pl.BlockSpec((9, Cout, Cout), lambda b: (0, 0, 0)),   # conv2 weights
            pl.BlockSpec((Cout, 1), lambda b: (0, 0)),            # bn2 scale
            pl.BlockSpec((Cout, 1), lambda b: (0, 0)),            # bn2 bias
        ],
        out_specs=pl.BlockSpec((1, Cout, n_out), lambda b: (b, 0, 0)),
        compiler_params=pltpu.CompilerParams(dimension_semantics=("parallel",)),
    )(xf, U, masks, w1c, s1, b1, w2c, s2, b2)

    return out.reshape(B, Cout, Ho, Wo)


# ----------------------------------------------------------------------------
# Pure-JAX reference (XLA conv / matmul) for correctness checking.
# ----------------------------------------------------------------------------
def up_reference(x, w1, s1, b1, w2, s2, b2):
    B, Cin, H, W = x.shape
    Ho, Wo = 2 * H, 2 * W
    U = _upsample_kron(H, W)
    xu = (x.reshape(B, Cin, H * W) @ U).reshape(B, Cin, Ho, Wo)

    def cbr(z, w, s, b):
        Cout, Cz = w.shape[1], w.shape[2]
        wk = jnp.transpose(w.reshape(3, 3, Cout, Cz), (2, 3, 0, 1))  # (O, I, kH, kW)
        y = jax.lax.conv_general_dilated(
            z, wk, window_strides=(1, 1), padding=((1, 1), (1, 1)),
            dimension_numbers=("NCHW", "OIHW", "NCHW"))
        return jnp.maximum(y * s.reshape(1, Cout, 1, 1) + b.reshape(1, Cout, 1, 1), 0.0)

    return cbr(cbr(xu, w1, s1, b1), w2, s2, b2)


# ----------------------------------------------------------------------------
# Deterministic parameter construction (conv bias + BN folded into scale/bias).
# ----------------------------------------------------------------------------
def _make_double_conv_params(key, cin, cout, eps=1e-5):
    def one(k, ci, co):
        kw, kb, kg, kbe, km, kv = jax.random.split(k, 6)
        w = jax.random.normal(kw, (3, 3, co, ci), jnp.float32) / np.sqrt(9 * ci)
        b = 0.1 * jax.random.normal(kb, (co,), jnp.float32)
        gamma = 1.0 + 0.1 * jax.random.normal(kg, (co,), jnp.float32)
        beta = 0.1 * jax.random.normal(kbe, (co,), jnp.float32)
        mean = 0.1 * jax.random.normal(km, (co,), jnp.float32)
        var = jnp.abs(jax.random.normal(kv, (co,), jnp.float32)) + 0.5
        scale = gamma / jnp.sqrt(var + eps)
        bias = beta + scale * (b - mean)
        # (9, Cout, Cin), tap index k = ky*3 + kx
        return w.reshape(9, co, ci), scale.reshape(co, 1), bias.reshape(co, 1)

    k1, k2 = jax.random.split(key)
    return one(k1, cin, cout), one(k2, cout, cout)


if __name__ == "__main__":
    key = jax.random.PRNGKey(0)
    # Small shapes consistent with up(in_ch=16, out_ch=8) on an 8x8 feature map.
    B, Cin, Cout, H, W = 2, 16, 8, 8, 8

    kx, kp = jax.random.split(key)
    x = jax.random.normal(kx, (B, Cin, H, W), jnp.float32)
    (w1, s1, b1), (w2, s2, b2) = _make_double_conv_params(kp, Cin, Cout)

    out = up_forward(x, w1, s1, b1, w2, s2, b2)
    jax.block_until_ready(out)
    assert out.shape == (B, Cout, 2 * H, 2 * W)

    ref = up_reference(x, w1, s1, b1, w2, s2, b2)
    np.testing.assert_allclose(np.asarray(out), np.asarray(ref), rtol=2e-2, atol=2e-2)

    print("KERNEL_OK")
</pallas_src>

<mosaic_0001>
module attributes {stable_mosaic.version = 11 : i64} {
  func.func @kernel(%arg0: i32, %arg1: memref<1x16x64xf32, #tpu.memory_space<vmem>>, %arg2: memref<64x256xf32, #tpu.memory_space<vmem>>, %arg3: memref<9x1x256xf32, #tpu.memory_space<vmem>>, %arg4: memref<9x8x16xf32, #tpu.memory_space<vmem>>, %arg5: memref<8x1xf32, #tpu.memory_space<vmem>>, %arg6: memref<8x1xf32, #tpu.memory_space<vmem>>, %arg7: memref<9x8x8xf32, #tpu.memory_space<vmem>>, %arg8: memref<8x1xf32, #tpu.memory_space<vmem>>, %arg9: memref<8x1xf32, #tpu.memory_space<vmem>>, %arg10: memref<1x8x256xf32, #tpu.memory_space<vmem>>) attributes {dimension_semantics = [#tpu.dimension_semantics<parallel>], iteration_bounds = array<i64: 2>, scalar_prefetch = 0 : i64, scratch_operands = 0 : i64, tpu.core_type = #tpu.core_type<tc>, window_params = [{transform_indices = @transform_0, window_bounds = array<i64: 1, 16, 64>}, {pipeline_mode = #tpu.pipeline_mode<synchronous>, transform_indices = @transform_1, window_bounds = array<i64: 64, 256>}, {pipeline_mode = #tpu.pipeline_mode<synchronous>, transform_indices = @transform_2, window_bounds = array<i64: 9, 1, 256>}, {pipeline_mode = #tpu.pipeline_mode<synchronous>, transform_indices = @transform_3, window_bounds = array<i64: 9, 8, 16>}, {pipeline_mode = #tpu.pipeline_mode<synchronous>, transform_indices = @transform_4, window_bounds = array<i64: 8, 1>}, {pipeline_mode = #tpu.pipeline_mode<synchronous>, transform_indices = @transform_5, window_bounds = array<i64: 8, 1>}, {pipeline_mode = #tpu.pipeline_mode<synchronous>, transform_indices = @transform_6, window_bounds = array<i64: 9, 8, 8>}, {pipeline_mode = #tpu.pipeline_mode<synchronous>, transform_indices = @transform_7, window_bounds = array<i64: 8, 1>}, {pipeline_mode = #tpu.pipeline_mode<synchronous>, transform_indices = @transform_8, window_bounds = array<i64: 8, 1>}, {transform_indices = @transform_9, window_bounds = array<i64: 1, 8, 256>}]} {
    %c0 = arith.constant 0 : index
    %c0_0 = arith.constant 0 : index
    %c0_1 = arith.constant 0 : index
    %0 = vector.load %arg1[%c0, %c0_0, %c0_1] : memref<1x16x64xf32, #tpu.memory_space<vmem>>, vector<1x16x64xf32>
    %1 = vector.shape_cast %0 : vector<1x16x64xf32> to vector<16x64xf32>
    %c0_2 = arith.constant 0 : index
    %c0_3 = arith.constant 0 : index
    %2 = vector.load %arg2[%c0_2, %c0_3] : memref<64x256xf32, #tpu.memory_space<vmem>>, vector<64x256xf32>
    %cst = arith.constant dense<0.000000e+00> : vector<16x256xf32>
    %3 = tpu.matmul %1, %2, %cst {dimension_numbers = #tpu.dot_dimension_numbers<[1], [0], [0], [1], [0, 0, 1, 1], [], []>} : vector<16x64xf32>, vector<64x256xf32>, vector<16x256xf32> -> vector<16x256xf32>
    %cst_4 = arith.constant 0.000000e+00 : f32
    %4 = vector.broadcast %cst_4 : f32 to vector<8x256xf32>
    %5 = vector.extract_strided_slice %3 {offsets = [0, 239], sizes = [16, 17], strides = [1, 1]} : vector<16x256xf32> to vector<16x17xf32>
    %6 = vector.extract_strided_slice %3 {offsets = [0, 0], sizes = [16, 239], strides = [1, 1]} : vector<16x256xf32> to vector<16x239xf32>
    %7 = tpu.concatenate %5, %6 in 1 : vector<16x17xf32>, vector<16x239xf32> -> vector<16x256xf32>
    %c0_5 = arith.constant 0 : index
    %c0_6 = arith.constant 0 : index
    %c0_7 = arith.constant 0 : index
    %8 = vector.load %arg3[%c0_5, %c0_6, %c0_7] : memref<9x1x256xf32, #tpu.memory_space<vmem>>, vector<1x1x256xf32>
    %9 = vector.shape_cast %8 : vector<1x1x256xf32> to vector<1x256xf32>
    %10 = vector.broadcast %9 : vector<1x256xf32> to vector<16x256xf32>
    %11 = arith.mulf %7, %10 : vector<16x256xf32>
    %c0_8 = arith.constant 0 : index
    %c0_9 = arith.constant 0 : index
    %c0_10 = arith.constant 0 : index
    %12 = vector.load %arg4[%c0_8, %c0_9, %c0_10] : memref<9x8x16xf32, #tpu.memory_space<vmem>>, vector<1x8x16xf32>
    %13 = vector.shape_cast %12 : vector<1x8x16xf32> to vector<8x16xf32>
    %cst_11 = arith.constant dense<0.000000e+00> : vector<8x256xf32>
    %14 = tpu.matmul %13, %11, %cst_11 {dimension_numbers = #tpu.dot_dimension_numbers<[1], [0], [0], [1], [0, 0, 1, 1], [], []>} : vector<8x16xf32>, vector<16x256xf32>, vector<8x256xf32> -> vector<8x256xf32>
    %15 = arith.addf %4, %14 : vector<8x256xf32>
    %16 = vector.extract_strided_slice %3 {offsets = [0, 240], sizes = [16, 16], strides = [1, 1]} : vector<16x256xf32> to vector<16x16xf32>
    %17 = vector.extract_strided_slice %3 {offsets = [0, 0], sizes = [16, 240], strides = [1, 1]} : vector<16x256xf32> to vector<16x240xf32>
    %18 = tpu.concatenate %16, %17 in 1 : vector<16x16xf32>, vector<16x240xf32> -> vector<16x256xf32>
    %c1 = arith.constant 1 : index
    %c0_12 = arith.constant 0 : index
    %c0_13 = arith.constant 0 : index
    %19 = vector.load %arg3[%c1, %c0_12, %c0_13] : memref<9x1x256xf32, #tpu.memory_space<vmem>>, vector<1x1x256xf32>
    %20 = vector.shape_cast %19 : vector<1x1x256xf32> to vector<1x256xf32>
    %21 = vector.broadcast %20 : vector<1x256xf32> to vector<16x256xf32>
    %22 = arith.mulf %18, %21 : vector<16x256xf32>
    %c1_14 = arith.constant 1 : index
    %c0_15 = arith.constant 0 : index
    %c0_16 = arith.constant 0 : index
    %23 = vector.load %arg4[%c1_14, %c0_15, %c0_16] : memref<9x8x16xf32, #tpu.memory_space<vmem>>, vector<1x8x16xf32>
    %24 = vector.shape_cast %23 : vector<1x8x16xf32> to vector<8x16xf32>
    %cst_17 = arith.constant dense<0.000000e+00> : vector<8x256xf32>
    %25 = tpu.matmul %24, %22, %cst_17 {dimension_numbers = #tpu.dot_dimension_numbers<[1], [0], [0], [1], [0, 0, 1, 1], [], []>} : vector<8x16xf32>, vector<16x256xf32>, vector<8x256xf32> -> vector<8x256xf32>
    %26 = arith.addf %15, %25 : vector<8x256xf32>
    %27 = vector.extract_strided_slice %3 {offsets = [0, 241], sizes = [16, 15], strides = [1, 1]} : vector<16x256xf32> to vector<16x15xf32>
    %28 = vector.extract_strided_slice %3 {offsets = [0, 0], sizes = [16, 241], strides = [1, 1]} : vector<16x256xf32> to vector<16x241xf32>
    %29 = tpu.concatenate %27, %28 in 1 : vector<16x15xf32>, vector<16x241xf32> -> vector<16x256xf32>
    %c2 = arith.constant 2 : index
    %c0_18 = arith.constant 0 : index
    %c0_19 = arith.constant 0 : index
    %30 = vector.load %arg3[%c2, %c0_18, %c0_19] : memref<9x1x256xf32, #tpu.memory_space<vmem>>, vector<1x1x256xf32>
    %31 = vector.shape_cast %30 : vector<1x1x256xf32> to vector<1x256xf32>
    %32 = vector.broadcast %31 : vector<1x256xf32> to vector<16x256xf32>
    %33 = arith.mulf %29, %32 : vector<16x256xf32>
    %c2_20 = arith.constant 2 : index
    %c0_21 = arith.constant 0 : index
    %c0_22 = arith.constant 0 : index
    %34 = vector.load %arg4[%c2_20, %c0_21, %c0_22] : memref<9x8x16xf32, #tpu.memory_space<vmem>>, vector<1x8x16xf32>
    %35 = vector.shape_cast %34 : vector<1x8x16xf32> to vector<8x16xf32>
    %cst_23 = arith.constant dense<0.000000e+00> : vector<8x256xf32>
    %36 = tpu.matmul %35, %33, %cst_23 {dimension_numbers = #tpu.dot_dimension_numbers<[1], [0], [0], [1], [0, 0, 1, 1], [], []>} : vector<8x16xf32>, vector<16x256xf32>, vector<8x256xf32> -> vector<8x256xf32>
    %37 = arith.addf %26, %36 : vector<8x256xf32>
    %38 = vector.extract_strided_slice %3 {offsets = [0, 255], sizes = [16, 1], strides = [1, 1]} : vector<16x256xf32> to vector<16x1xf32>
    %39 = vector.extract_strided_slice %3 {offsets = [0, 0], sizes = [16, 255], strides = [1, 1]} : vector<16x256xf32> to vector<16x255xf32>
    %40 = tpu.concatenate %38, %39 in 1 : vector<16x1xf32>, vector<16x255xf32> -> vector<16x256xf32>
    %c3 = arith.constant 3 : index
    %c0_24 = arith.constant 0 : index
    %c0_25 = arith.constant 0 : index
    %41 = vector.load %arg3[%c3, %c0_24, %c0_25] : memref<9x1x256xf32, #tpu.memory_space<vmem>>, vector<1x1x256xf32>
    %42 = vector.shape_cast %41 : vector<1x1x256xf32> to vector<1x256xf32>
    %43 = vector.broadcast %42 : vector<1x256xf32> to vector<16x256xf32>
    %44 = arith.mulf %40, %43 : vector<16x256xf32>
    %c3_26 = arith.constant 3 : index
    %c0_27 = arith.constant 0 : index
    %c0_28 = arith.constant 0 : index
    %45 = vector.load %arg4[%c3_26, %c0_27, %c0_28] : memref<9x8x16xf32, #tpu.memory_space<vmem>>, vector<1x8x16xf32>
    %46 = vector.shape_cast %45 : vector<1x8x16xf32> to vector<8x16xf32>
    %cst_29 = arith.constant dense<0.000000e+00> : vector<8x256xf32>
    %47 = tpu.matmul %46, %44, %cst_29 {dimension_numbers = #tpu.dot_dimension_numbers<[1], [0], [0], [1], [0, 0, 1, 1], [], []>} : vector<8x16xf32>, vector<16x256xf32>, vector<8x256xf32> -> vector<8x256xf32>
    %48 = arith.addf %37, %47 : vector<8x256xf32>
    %c4 = arith.constant 4 : index
    %c0_30 = arith.constant 0 : index
    %c0_31 = arith.constant 0 : index
    %49 = vector.load %arg4[%c4, %c0_30, %c0_31] : memref<9x8x16xf32, #tpu.memory_space<vmem>>, vector<1x8x16xf32>
    %50 = vector.shape_cast %49 : vector<1x8x16xf32> to vector<8x16xf32>
    %cst_32 = arith.constant dense<0.000000e+00> : vector<8x256xf32>
    %51 = tpu.matmul %50, %3, %cst_32 {dimension_numbers = #tpu.dot_dimension_numbers<[1], [0], [0], [1], [0, 0, 1, 1], [], []>} : vector<8x16xf32>, vector<16x256xf32>, vector<8x256xf32> -> vector<8x256xf32>
    %52 = arith.addf %48, %51 : vector<8x256xf32>
    %53 = vector.extract_strided_slice %3 {offsets = [0, 1], sizes = [16, 255], strides = [1, 1]} : vector<16x256xf32> to vector<16x255xf32>
    %54 = vector.extract_strided_slice %3 {offsets = [0, 0], sizes = [16, 1], strides = [1, 1]} : vector<16x256xf32> to vector<16x1xf32>
    %55 = tpu.concatenate %53, %54 in 1 : vector<16x255xf32>, vector<16x1xf32> -> vector<16x256xf32>
    %c5 = arith.constant 5 : index
    %c0_33 = arith.constant 0 : index
    %c0_34 = arith.constant 0 : index
    %56 = vector.load %arg3[%c5, %c0_33, %c0_34] : memref<9x1x256xf32, #tpu.memory_space<vmem>>, vector<1x1x256xf32>
    %57 = vector.shape_cast %56 : vector<1x1x256xf32> to vector<1x256xf32>
    %58 = vector.broadcast %57 : vector<1x256xf32> to vector<16x256xf32>
    %59 = arith.mulf %55, %58 : vector<16x256xf32>
    %c5_35 = arith.constant 5 : index
    %c0_36 = arith.constant 0 : index
    %c0_37 = arith.constant 0 : index
    %60 = vector.load %arg4[%c5_35, %c0_36, %c0_37] : memref<9x8x16xf32, #tpu.memory_space<vmem>>, vector<1x8x16xf32>
    %61 = vector.shape_cast %60 : vector<1x8x16xf32> to vector<8x16xf32>
    %cst_38 = arith.constant dense<0.000000e+00> : vector<8x256xf32>
    %62 = tpu.matmul %61, %59, %cst_38 {dimension_numbers = #tpu.dot_dimension_numbers<[1], [0], [0], [1], [0, 0, 1, 1], [], []>} : vector<8x16xf32>, vector<16x256xf32>, vector<8x256xf32> -> vector<8x256xf32>
    %63 = arith.addf %52, %62 : vector<8x256xf32>
    %64 = vector.extract_strided_slice %3 {offsets = [0, 15], sizes = [16, 241], strides = [1, 1]} : vector<16x256xf32> to vector<16x241xf32>
    %65 = vector.extract_strided_slice %3 {offsets = [0, 0], sizes = [16, 15], strides = [1, 1]} : vector<16x256xf32> to vector<16x15xf32>
    %66 = tpu.concatenate %64, %65 in 1 : vector<16x241xf32>, vector<16x15xf32> -> vector<16x256xf32>
    %c6 = arith.constant 6 : index
    %c0_39 = arith.constant 0 : index
    %c0_40 = arith.constant 0 : index
    %67 = vector.load %arg3[%c6, %c0_39, %c0_40] : memref<9x1x256xf32, #tpu.memory_space<vmem>>, vector<1x1x256xf32>
    %68 = vector.shape_cast %67 : vector<1x1x256xf32> to vector<1x256xf32>
    %69 = vector.broadcast %68 : vector<1x256xf32> to vector<16x256xf32>
    %70 = arith.mulf %66, %69 : vector<16x256xf32>
    %c6_41 = arith.constant 6 : index
    %c0_42 = arith.constant 0 : index
    %c0_43 = arith.constant 0 : index
    %71 = vector.load %arg4[%c6_41, %c0_42, %c0_43] : memref<9x8x16xf32, #tpu.memory_space<vmem>>, vector<1x8x16xf32>
    %72 = vector.shape_cast %71 : vector<1x8x16xf32> to vector<8x16xf32>
    %cst_44 = arith.constant dense<0.000000e+00> : vector<8x256xf32>
    %73 = tpu.matmul %72, %70, %cst_44 {dimension_numbers = #tpu.dot_dimension_numbers<[1], [0], [0], [1], [0, 0, 1, 1], [], []>} : vector<8x16xf32>, vector<16x256xf32>, vector<8x256xf32> -> vector<8x256xf32>
    %74 = arith.addf %63, %73 : vector<8x256xf32>
    %75 = vector.extract_strided_slice %3 {offsets = [0, 16], sizes = [16, 240], strides = [1, 1]} : vector<16x256xf32> to vector<16x240xf32>
    %76 = vector.extract_strided_slice %3 {offsets = [0, 0], sizes = [16, 16], strides = [1, 1]} : vector<16x256xf32> to vector<16x16xf32>
    %77 = tpu.concatenate %75, %76 in 1 : vector<16x240xf32>, vector<16x16xf32> -> vector<16x256xf32>
    %c7 = arith.constant 7 : index
    %c0_45 = arith.constant 0 : index
    %c0_46 = arith.constant 0 : index
    %78 = vector.load %arg3[%c7, %c0_45, %c0_46] : memref<9x1x256xf32, #tpu.memory_space<vmem>>, vector<1x1x256xf32>
    %79 = vector.shape_cast %78 : vector<1x1x256xf32> to vector<1x256xf32>
    %80 = vector.broadcast %79 : vector<1x256xf32> to vector<16x256xf32>
    %81 = arith.mulf %77, %80 : vector<16x256xf32>
    %c7_47 = arith.constant 7 : index
    %c0_48 = arith.constant 0 : index
    %c0_49 = arith.constant 0 : index
    %82 = vector.load %arg4[%c7_47, %c0_48, %c0_49] : memref<9x8x16xf32, #tpu.memory_space<vmem>>, vector<1x8x16xf32>
    %83 = vector.shape_cast %82 : vector<1x8x16xf32> to vector<8x16xf32>
    %cst_50 = arith.constant dense<0.000000e+00> : vector<8x256xf32>
    %84 = tpu.matmul %83, %81, %cst_50 {dimension_numbers = #tpu.dot_dimension_numbers<[1], [0], [0], [1], [0, 0, 1, 1], [], []>} : vector<8x16xf32>, vector<16x256xf32>, vector<8x256xf32> -> vector<8x256xf32>
    %85 = arith.addf %74, %84 : vector<8x256xf32>
    %86 = vector.extract_strided_slice %3 {offsets = [0, 17], sizes = [16, 239], strides = [1, 1]} : vector<16x256xf32> to vector<16x239xf32>
    %87 = vector.extract_strided_slice %3 {offsets = [0, 0], sizes = [16, 17], strides = [1, 1]} : vector<16x256xf32> to vector<16x17xf32>
    %88 = tpu.concatenate %86, %87 in 1 : vector<16x239xf32>, vector<16x17xf32> -> vector<16x256xf32>
    %c8 = arith.constant 8 : index
    %c0_51 = arith.constant 0 : index
    %c0_52 = arith.constant 0 : index
    %89 = vector.load %arg3[%c8, %c0_51, %c0_52] : memref<9x1x256xf32, #tpu.memory_space<vmem>>, vector<1x1x256xf32>
    %90 = vector.shape_cast %89 : vector<1x1x256xf32> to vector<1x256xf32>
    %91 = vector.broadcast %90 : vector<1x256xf32> to vector<16x256xf32>
    %92 = arith.mulf %88, %91 : vector<16x256xf32>
    %c8_53 = arith.constant 8 : index
    %c0_54 = arith.constant 0 : index
    %c0_55 = arith.constant 0 : index
    %93 = vector.load %arg4[%c8_53, %c0_54, %c0_55] : memref<9x8x16xf32, #tpu.memory_space<vmem>>, vector<1x8x16xf32>
    %94 = vector.shape_cast %93 : vector<1x8x16xf32> to vector<8x16xf32>
    %cst_56 = arith.constant dense<0.000000e+00> : vector<8x256xf32>
    %95 = tpu.matmul %94, %92, %cst_56 {dimension_numbers = #tpu.dot_dimension_numbers<[1], [0], [0], [1], [0, 0, 1, 1], [], []>} : vector<8x16xf32>, vector<16x256xf32>, vector<8x256xf32> -> vector<8x256xf32>
    %96 = arith.addf %85, %95 : vector<8x256xf32>
    %c0_57 = arith.constant 0 : index
    %c0_58 = arith.constant 0 : index
    %97 = vector.load %arg5[%c0_57, %c0_58] : memref<8x1xf32, #tpu.memory_space<vmem>>, vector<8x1xf32>
    %98 = vector.broadcast %97 : vector<8x1xf32> to vector<8x256xf32>
    %99 = arith.mulf %96, %98 : vector<8x256xf32>
    %c0_59 = arith.constant 0 : index
    %c0_60 = arith.constant 0 : index
    %100 = vector.load %arg6[%c0_59, %c0_60] : memref<8x1xf32, #tpu.memory_space<vmem>>, vector<8x1xf32>
    %101 = vector.broadcast %100 : vector<8x1xf32> to vector<8x256xf32>
    %102 = arith.addf %99, %101 : vector<8x256xf32>
    %cst_61 = arith.constant 0.000000e+00 : f32
    %103 = vector.broadcast %cst_61 : f32 to vector<8x256xf32>
    %104 = arith.maximumf %102, %103 : vector<8x256xf32>
    %cst_62 = arith.constant 0.000000e+00 : f32
    %105 = vector.broadcast %cst_62 : f32 to vector<8x256xf32>
    %106 = vector.extract_strided_slice %104 {offsets = [0, 239], sizes = [8, 17], strides = [1, 1]} : vector<8x256xf32> to vector<8x17xf32>
    %107 = vector.extract_strided_slice %104 {offsets = [0, 0], sizes = [8, 239], strides = [1, 1]} : vector<8x256xf32> to vector<8x239xf32>
    %108 = tpu.concatenate %106, %107 in 1 : vector<8x17xf32>, vector<8x239xf32> -> vector<8x256xf32>
    %c0_63 = arith.constant 0 : index
    %c0_64 = arith.constant 0 : index
    %c0_65 = arith.constant 0 : index
    %109 = vector.load %arg3[%c0_63, %c0_64, %c0_65] : memref<9x1x256xf32, #tpu.memory_space<vmem>>, vector<1x1x256xf32>
    %110 = vector.shape_cast %109 : vector<1x1x256xf32> to vector<1x256xf32>
    %111 = vector.broadcast %110 : vector<1x256xf32> to vector<8x256xf32>
    %112 = arith.mulf %108, %111 : vector<8x256xf32>
    %c0_66 = arith.constant 0 : index
    %c0_67 = arith.constant 0 : index
    %c0_68 = arith.constant 0 : index
    %113 = vector.load %arg7[%c0_66, %c0_67, %c0_68] : memref<9x8x8xf32, #tpu.memory_space<vmem>>, vector<1x8x8xf32>
    %114 = vector.shape_cast %113 : vector<1x8x8xf32> to vector<8x8xf32>
    %cst_69 = arith.constant dense<0.000000e+00> : vector<8x256xf32>
    %115 = tpu.matmul %114, %112, %cst_69 {dimension_numbers = #tpu.dot_dimension_numbers<[1], [0], [0], [1], [0, 0, 1, 1], [], []>} : vector<8x8xf32>, vector<8x256xf32>, vector<8x256xf32> -> vector<8x256xf32>
    %116 = arith.addf %105, %115 : vector<8x256xf32>
    %117 = vector.extract_strided_slice %104 {offsets = [0, 240], sizes = [8, 16], strides = [1, 1]} : vector<8x256xf32> to vector<8x16xf32>
    %118 = vector.extract_strided_slice %104 {offsets = [0, 0], sizes = [8, 240], strides = [1, 1]} : vector<8x256xf32> to vector<8x240xf32>
    %119 = tpu.concatenate %117, %118 in 1 : vector<8x16xf32>, vector<8x240xf32> -> vector<8x256xf32>
    %c1_70 = arith.constant 1 : index
    %c0_71 = arith.constant 0 : index
    %c0_72 = arith.constant 0 : index
    %120 = vector.load %arg3[%c1_70, %c0_71, %c0_72] : memref<9x1x256xf32, #tpu.memory_space<vmem>>, vector<1x1x256xf32>
    %121 = vector.shape_cast %120 : vector<1x1x256xf32> to vector<1x256xf32>
    %122 = vector.broadcast %121 : vector<1x256xf32> to vector<8x256xf32>
    %123 = arith.mulf %119, %122 : vector<8x256xf32>
    %c1_73 = arith.constant 1 : index
    %c0_74 = arith.constant 0 : index
    %c0_75 = arith.constant 0 : index
    %124 = vector.load %arg7[%c1_73, %c0_74, %c0_75] : memref<9x8x8xf32, #tpu.memory_space<vmem>>, vector<1x8x8xf32>
    %125 = vector.shape_cast %124 : vector<1x8x8xf32> to vector<8x8xf32>
    %cst_76 = arith.constant dense<0.000000e+00> : vector<8x256xf32>
    %126 = tpu.matmul %125, %123, %cst_76 {dimension_numbers = #tpu.dot_dimension_numbers<[1], [0], [0], [1], [0, 0, 1, 1], [], []>} : vector<8x8xf32>, vector<8x256xf32>, vector<8x256xf32> -> vector<8x256xf32>
    %127 = arith.addf %116, %126 : vector<8x256xf32>
    %128 = vector.extract_strided_slice %104 {offsets = [0, 241], sizes = [8, 15], strides = [1, 1]} : vector<8x256xf32> to vector<8x15xf32>
    %129 = vector.extract_strided_slice %104 {offsets = [0, 0], sizes = [8, 241], strides = [1, 1]} : vector<8x256xf32> to vector<8x241xf32>
    %130 = tpu.concatenate %128, %129 in 1 : vector<8x15xf32>, vector<8x241xf32> -> vector<8x256xf32>
    %c2_77 = arith.constant 2 : index
    %c0_78 = arith.constant 0 : index
    %c0_79 = arith.constant 0 : index
    %131 = vector.load %arg3[%c2_77, %c0_78, %c0_79] : memref<9x1x256xf32, #tpu.memory_space<vmem>>, vector<1x1x256xf32>
    %132 = vector.shape_cast %131 : vector<1x1x256xf32> to vector<1x256xf32>
    %133 = vector.broadcast %132 : vector<1x256xf32> to vector<8x256xf32>
    %134 = arith.mulf %130, %133 : vector<8x256xf32>
    %c2_80 = arith.constant 2 : index
    %c0_81 = arith.constant 0 : index
    %c0_82 = arith.constant 0 : index
    %135 = vector.load %arg7[%c2_80, %c0_81, %c0_82] : memref<9x8x8xf32, #tpu.memory_space<vmem>>, vector<1x8x8xf32>
    %136 = vector.shape_cast %135 : vector<1x8x8xf32> to vector<8x8xf32>
    %cst_83 = arith.constant dense<0.000000e+00> : vector<8x256xf32>
    %137 = tpu.matmul %136, %134, %cst_83 {dimension_numbers = #tpu.dot_dimension_numbers<[1], [0], [0], [1], [0, 0, 1, 1], [], []>} : vector<8x8xf32>, vector<8x256xf32>, vector<8x256xf32> -> vector<8x256xf32>
    %138 = arith.addf %127, %137 : vector<8x256xf32>
    %139 = vector.extract_strided_slice %104 {offsets = [0, 255], sizes = [8, 1], strides = [1, 1]} : vector<8x256xf32> to vector<8x1xf32>
    %140 = vector.extract_strided_slice %104 {offsets = [0, 0], sizes = [8, 255], strides = [1, 1]} : vector<8x256xf32> to vector<8x255xf32>
    %141 = tpu.concatenate %139, %140 in 1 : vector<8x1xf32>, vector<8x255xf32> -> vector<8x256xf32>
    %c3_84 = arith.constant 3 : index
    %c0_85 = arith.constant 0 : index
    %c0_86 = arith.constant 0 : index
    %142 = vector.load %arg3[%c3_84, %c0_85, %c0_86] : memref<9x1x256xf32, #tpu.memory_space<vmem>>, vector<1x1x256xf32>
    %143 = vector.shape_cast %142 : vector<1x1x256xf32> to vector<1x256xf32>
    %144 = vector.broadcast %143 : vector<1x256xf32> to vector<8x256xf32>
    %145 = arith.mulf %141, %144 : vector<8x256xf32>
    %c3_87 = arith.constant 3 : index
    %c0_88 = arith.constant 0 : index
    %c0_89 = arith.constant 0 : index
    %146 = vector.load %arg7[%c3_87, %c0_88, %c0_89] : memref<9x8x8xf32, #tpu.memory_space<vmem>>, vector<1x8x8xf32>
    %147 = vector.shape_cast %146 : vector<1x8x8xf32> to vector<8x8xf32>
    %cst_90 = arith.constant dense<0.000000e+00> : vector<8x256xf32>
    %148 = tpu.matmul %147, %145, %cst_90 {dimension_numbers = #tpu.dot_dimension_numbers<[1], [0], [0], [1], [0, 0, 1, 1], [], []>} : vector<8x8xf32>, vector<8x256xf32>, vector<8x256xf32> -> vector<8x256xf32>
    %149 = arith.addf %138, %148 : vector<8x256xf32>
    %c4_91 = arith.constant 4 : index
    %c0_92 = arith.constant 0 : index
    %c0_93 = arith.constant 0 : index
    %150 = vector.load %arg7[%c4_91, %c0_92, %c0_93] : memref<9x8x8xf32, #tpu.memory_space<vmem>>, vector<1x8x8xf32>
    %151 = vector.shape_cast %150 : vector<1x8x8xf32> to vector<8x8xf32>
    %cst_94 = arith.constant dense<0.000000e+00> : vector<8x256xf32>
    %152 = tpu.matmul %151, %104, %cst_94 {dimension_numbers = #tpu.dot_dimension_numbers<[1], [0], [0], [1], [0, 0, 1, 1], [], []>} : vector<8x8xf32>, vector<8x256xf32>, vector<8x256xf32> -> vector<8x256xf32>
    %153 = arith.addf %149, %152 : vector<8x256xf32>
    %154 = vector.extract_strided_slice %104 {offsets = [0, 1], sizes = [8, 255], strides = [1, 1]} : vector<8x256xf32> to vector<8x255xf32>
    %155 = vector.extract_strided_slice %104 {offsets = [0, 0], sizes = [8, 1], strides = [1, 1]} : vector<8x256xf32> to vector<8x1xf32>
    %156 = tpu.concatenate %154, %155 in 1 : vector<8x255xf32>, vector<8x1xf32> -> vector<8x256xf32>
    %c5_95 = arith.constant 5 : index
    %c0_96 = arith.constant 0 : index
    %c0_97 = arith.constant 0 : index
    %157 = vector.load %arg3[%c5_95, %c0_96, %c0_97] : memref<9x1x256xf32, #tpu.memory_space<vmem>>, vector<1x1x256xf32>
    %158 = vector.shape_cast %157 : vector<1x1x256xf32> to vector<1x256xf32>
    %159 = vector.broadcast %158 : vector<1x256xf32> to vector<8x256xf32>
    %160 = arith.mulf %156, %159 : vector<8x256xf32>
    %c5_98 = arith.constant 5 : index
    %c0_99 = arith.constant 0 : index
    %c0_100 = arith.constant 0 : index
    %161 = vector.load %arg7[%c5_98, %c0_99, %c0_100] : memref<9x8x8xf32, #tpu.memory_space<vmem>>, vector<1x8x8xf32>
    %162 = vector.shape_cast %161 : vector<1x8x8xf32> to vector<8x8xf32>
    %cst_101 = arith.constant dense<0.000000e+00> : vector<8x256xf32>
    %163 = tpu.matmul %162, %160, %cst_101 {dimension_numbers = #tpu.dot_dimension_numbers<[1], [0], [0], [1], [0, 0, 1, 1], [], []>} : vector<8x8xf32>, vector<8x256xf32>, vector<8x256xf32> -> vector<8x256xf32>
    %164 = arith.addf %153, %163 : vector<8x256xf32>
    %165 = vector.extract_strided_slice %104 {offsets = [0, 15], sizes = [8, 241], strides = [1, 1]} : vector<8x256xf32> to vector<8x241xf32>
    %166 = vector.extract_strided_slice %104 {offsets = [0, 0], sizes = [8, 15], strides = [1, 1]} : vector<8x256xf32> to vector<8x15xf32>
    %167 = tpu.concatenate %165, %166 in 1 : vector<8x241xf32>, vector<8x15xf32> -> vector<8x256xf32>
    %c6_102 = arith.constant 6 : index
    %c0_103 = arith.constant 0 : index
    %c0_104 = arith.constant 0 : index
    %168 = vector.load %arg3[%c6_102, %c0_103, %c0_104] : memref<9x1x256xf32, #tpu.memory_space<vmem>>, vector<1x1x256xf32>
    %169 = vector.shape_cast %168 : vector<1x1x256xf32> to vector<1x256xf32>
    %170 = vector.broadcast %169 : vector<1x256xf32> to vector<8x256xf32>
    %171 = arith.mulf %167, %170 : vector<8x256xf32>
    %c6_105 = arith.constant 6 : index
    %c0_106 = arith.constant 0 : index
    %c0_107 = arith.constant 0 : index
    %172 = vector.load %arg7[%c6_105, %c0_106, %c0_107] : memref<9x8x8xf32, #tpu.memory_space<vmem>>, vector<1x8x8xf32>
    %173 = vector.shape_cast %172 : vector<1x8x8xf32> to vector<8x8xf32>
    %cst_108 = arith.constant dense<0.000000e+00> : vector<8x256xf32>
    %174 = tpu.matmul %173, %171, %cst_108 {dimension_numbers = #tpu.dot_dimension_numbers<[1], [0], [0], [1], [0, 0, 1, 1], [], []>} : vector<8x8xf32>, vector<8x256xf32>, vector<8x256xf32> -> vector<8x256xf32>
    %175 = arith.addf %164, %174 : vector<8x256xf32>
    %176 = vector.extract_strided_slice %104 {offsets = [0, 16], sizes = [8, 240], strides = [1, 1]} : vector<8x256xf32> to vector<8x240xf32>
    %177 = vector.extract_strided_slice %104 {offsets = [0, 0], sizes = [8, 16], strides = [1, 1]} : vector<8x256xf32> to vector<8x16xf32>
    %178 = tpu.concatenate %176, %177 in 1 : vector<8x240xf32>, vector<8x16xf32> -> vector<8x256xf32>
    %c7_109 = arith.constant 7 : index
    %c0_110 = arith.constant 0 : index
    %c0_111 = arith.constant 0 : index
    %179 = vector.load %arg3[%c7_109, %c0_110, %c0_111] : memref<9x1x256xf32, #tpu.memory_space<vmem>>, vector<1x1x256xf32>
    %180 = vector.shape_cast %179 : vector<1x1x256xf32> to vector<1x256xf32>
    %181 = vector.broadcast %180 : vector<1x256xf32> to vector<8x256xf32>
    %182 = arith.mulf %178, %181 : vector<8x256xf32>
    %c7_112 = arith.constant 7 : index
    %c0_113 = arith.constant 0 : index
    %c0_114 = arith.constant 0 : index
    %183 = vector.load %arg7[%c7_112, %c0_113, %c0_114] : memref<9x8x8xf32, #tpu.memory_space<vmem>>, vector<1x8x8xf32>
    %184 = vector.shape_cast %183 : vector<1x8x8xf32> to vector<8x8xf32>
    %cst_115 = arith.constant dense<0.000000e+00> : vector<8x256xf32>
    %185 = tpu.matmul %184, %182, %cst_115 {dimension_numbers = #tpu.dot_dimension_numbers<[1], [0], [0], [1], [0, 0, 1, 1], [], []>} : vector<8x8xf32>, vector<8x256xf32>, vector<8x256xf32> -> vector<8x256xf32>
    %186 = arith.addf %175, %185 : vector<8x256xf32>
    %187 = vector.extract_strided_slice %104 {offsets = [0, 17], sizes = [8, 239], strides = [1, 1]} : vector<8x256xf32> to vector<8x239xf32>
    %188 = vector.extract_strided_slice %104 {offsets = [0, 0], sizes = [8, 17], strides = [1, 1]} : vector<8x256xf32> to vector<8x17xf32>
    %189 = tpu.concatenate %187, %188 in 1 : vector<8x239xf32>, vector<8x17xf32> -> vector<8x256xf32>
    %c8_116 = arith.constant 8 : index
    %c0_117 = arith.constant 0 : index
    %c0_118 = arith.constant 0 : index
    %190 = vector.load %arg3[%c8_116, %c0_117, %c0_118] : memref<9x1x256xf32, #tpu.memory_space<vmem>>, vector<1x1x256xf32>
    %191 = vector.shape_cast %190 : vector<1x1x256xf32> to vector<1x256xf32>
    %192 = vector.broadcast %191 : vector<1x256xf32> to vector<8x256xf32>
    %193 = arith.mulf %189, %192 : vector<8x256xf32>
    %c8_119 = arith.constant 8 : index
    %c0_120 = arith.constant 0 : index
    %c0_121 = arith.constant 0 : index
    %194 = vector.load %arg7[%c8_119, %c0_120, %c0_121] : memref<9x8x8xf32, #tpu.memory_space<vmem>>, vector<1x8x8xf32>
    %195 = vector.shape_cast %194 : vector<1x8x8xf32> to vector<8x8xf32>
    %cst_122 = arith.constant dense<0.000000e+00> : vector<8x256xf32>
    %196 = tpu.matmul %195, %193, %cst_122 {dimension_numbers = #tpu.dot_dimension_numbers<[1], [0], [0], [1], [0, 0, 1, 1], [], []>} : vector<8x8xf32>, vector<8x256xf32>, vector<8x256xf32> -> vector<8x256xf32>
    %197 = arith.addf %186, %196 : vector<8x256xf32>
    %c0_123 = arith.constant 0 : index
    %c0_124 = arith.constant 0 : index
    %198 = vector.load %arg8[%c0_123, %c0_124] : memref<8x1xf32, #tpu.memory_space<vmem>>, vector<8x1xf32>
    %199 = vector.broadcast %198 : vector<8x1xf32> to vector<8x256xf32>
    %200 = arith.mulf %197, %199 : vector<8x256xf32>
    %c0_125 = arith.constant 0 : index
    %c0_126 = arith.constant 0 : index
    %201 = vector.load %arg9[%c0_125, %c0_126] : memref<8x1xf32, #tpu.memory_space<vmem>>, vector<8x1xf32>
    %202 = vector.broadcast %201 : vector<8x1xf32> to vector<8x256xf32>
    %203 = arith.addf %200, %202 : vector<8x256xf32>
    %cst_127 = arith.constant 0.000000e+00 : f32
    %204 = vector.broadcast %cst_127 : f32 to vector<8x256xf32>
    %205 = arith.maximumf %203, %204 : vector<8x256xf32>
    %c0_128 = arith.constant 0 : index
    %c0_129 = arith.constant 0 : index
    %c0_130 = arith.constant 0 : index
    %206 = vector.load %arg10[%c0_128, %c0_129, %c0_130] : memref<1x8x256xf32, #tpu.memory_space<vmem>>, vector<1x8x256xf32>
    %207 = vector.shape_cast %206 : vector<1x8x256xf32> to vector<8x256xf32>
    %208 = vector.shape_cast %205 : vector<8x256xf32> to vector<1x8x256xf32>
    tpu.vector_store %arg10[%c0_128, %c0_129, %c0_130], %208 {strides = array<i32>} : memref<1x8x256xf32, #tpu.memory_space<vmem>>, vector<1x8x256xf32>,
    return
  }
  func.func @transform_0(%arg0: i32) -> (i32, i32, i32) {
    %c0_i32 = arith.constant 0 : i32
    %c0_i32_0 = arith.constant 0 : i32
    %c0_i32_1 = arith.constant 0 : i32
    return %arg0, %c0_i32, %c0_i32_0 : i32, i32, i32
  }
  func.func @transform_1(%arg0: i32) -> (i32, i32) {
    %c0_i32 = arith.constant 0 : i32
    %c0_i32_0 = arith.constant 0 : i32
    %c0_i32_1 = arith.constant 0 : i32
    return %c0_i32, %c0_i32_0 : i32, i32
  }
  func.func @transform_2(%arg0: i32) -> (i32, i32, i32) {
    %c0_i32 = arith.constant 0 : i32
    %c0_i32_0 = arith.constant 0 : i32
    %c0_i32_1 = arith.constant 0 : i32
    %c0_i32_2 = arith.constant 0 : i32
    return %c0_i32, %c0_i32_0, %c0_i32_1 : i32, i32, i32
  }
  func.func @transform_3(%arg0: i32) -> (i32, i32, i32) {
    %c0_i32 = arith.constant 0 : i32
    %c0_i32_0 = arith.constant 0 : i32
    %c0_i32_1 = arith.constant 0 : i32
    %c0_i32_2 = arith.constant 0 : i32
    return %c0_i32, %c0_i32_0, %c0_i32_1 : i32, i32, i32
  }
  func.func @transform_4(%arg0: i32) -> (i32, i32) {
    %c0_i32 = arith.constant 0 : i32
    %c0_i32_0 = arith.constant 0 : i32
    %c0_i32_1 = arith.constant 0 : i32
    return %c0_i32, %c0_i32_0 : i32, i32
  }
  func.func @transform_5(%arg0: i32) -> (i32, i32) {
    %c0_i32 = arith.constant 0 : i32
    %c0_i32_0 = arith.constant 0 : i32
    %c0_i32_1 = arith.constant 0 : i32
    return %c0_i32, %c0_i32_0 : i32, i32
  }
  func.func @transform_6(%arg0: i32) -> (i32, i32, i32) {
    %c0_i32 = arith.constant 0 : i32
    %c0_i32_0 = arith.constant 0 : i32
    %c0_i32_1 = arith.constant 0 : i32
    %c0_i32_2 = arith.constant 0 : i32
    return %c0_i32, %c0_i32_0, %c0_i32_1 : i32, i32, i32
  }
  func.func @transform_7(%arg0: i32) -> (i32, i32) {
    %c0_i32 = arith.constant 0 : i32
    %c0_i32_0 = arith.constant 0 : i32
    %c0_i32_1 = arith.constant 0 : i32
    return %c0_i32, %c0_i32_0 : i32, i32
  }
  func.func @transform_8(%arg0: i32) -> (i32, i32) {
    %c0_i32 = arith.constant 0 : i32
    %c0_i32_0 = arith.constant 0 : i32
    %c0_i32_1 = arith.constant 0 : i32
    return %c0_i32, %c0_i32_0 : i32, i32
  }
  func.func @transform_9(%arg0: i32) -> (i32, i32, i32) {
    %c0_i32 = arith.constant 0 : i32
    %c0_i32_0 = arith.constant 0 : i32
    %c0_i32_1 = arith.constant 0 : i32
    return %arg0, %c0_i32, %c0_i32_0 : i32, i32, i32
  }
}

</mosaic_0001>

<bundles_post_ra>
// kernel: tpu_custom_call.1
= control target key start
LH: loop header
LB: loop body
LE: loop exit
PB: predicated region body
PF: predicated region fallthrough
CT: control target
= control target key end

     0   :  { %14 = vsyncpa [#allocation3], 0  ;;  %s3224_s0 = inlined_call_operand.vmem [shape: f32[2,16,64], index: 0, kind: input, shape index: {}]   ;;  %s3225_s1 = inlined_call_operand.vmem [shape: f32[64,256], index: 1, kind: input, shape index: {}]   ;;  %s3226_s2 = inlined_call_operand.hbm [shape: f32[9,1,256], index: 2, kind: input, shape index: {}]   ;;  %s3227_s3 = inlined_call_operand.hbm [shape: f32[9,8,16], index: 3, kind: input, shape index: {}]   ;;  %s3228_s4 = inlined_call_operand.vmem [shape: f32[8,1], index: 4, kind: input, shape index: {}]   ;;  %s3229_s5 = inlined_call_operand.vmem [shape: f32[8,1], index: 5, kind: input, shape index: {}]   ;;  %s3230_s6 = inlined_call_operand.vmem [shape: f32[9,8,8], index: 6, kind: input, shape index: {}]   ;;  %s3231_s7 = inlined_call_operand.vmem [shape: f32[8,1], index: 7, kind: input, shape index: {}]   ;;  %s3232_s8 = inlined_call_operand.vmem [shape: f32[8,1], index: 8, kind: input, shape index: {}]   ;;  %s3233_s9 = inlined_call_operand.hbm [shape: f32[2,8,256], index: 9, kind: output, shape index: {}]  }
   0x1   :  { %15 = vsyncpa [#allocation6], 0 }
   0x2   :  { %16 = vsyncpa [#allocation4], 0 }
   0x3   :  { %18 = vsyncpa [#allocation4 + $0x1], 0  ;;  %s2684_s30 = smov 0   ;;  %s2686_s10 = smov 0  }
   0x4   :  { %s2688_s11 = smov 0   ;;  %s2690_s12 = smov 0  }
   0x5 LB: > { %s2705_s13 = sadd.s32 4294967295, %s2615_s12   ;;  %s2373_s14 = sadd.s32 4294967294, %s2615_s12   ;;  %s2615_s12 = sphi %s2690_s12, %s3249_s12   ;;  %s2611_s11 = sphi %s2688_s11, %s3248_s11   ;;  %s2607_s10 = sphi %s2686_s10, %s3247_s10   ;;  %s2603_s30 = sphi %s2684_s30, %s3246_s30  }
   0x6   : > { %s2709_s15 = sadd.s32 1, %s2615_s12   ;;  %s225_s16 = sadd.s32 1, %s2611_s11 }
   0x7   : > { %s222_s17 = ssub.s32 %s2615_s12, %s2709_s15  ;;  %p235_p0 = scmp.ne.s32.totalorder %s2611_s11, %s2607_s10 }
   0x8   : > { %p223_p1 = scmp.eq.s32.totalorder %s222_s17, 0  ;;  %p236_p2 = scmp.eq.s32.totalorder %s2705_s13, 1 }
   0x9   : > { %p241_p3 = scmp.ne.s32.totalorder %s2607_s10, %s2603_s30  ;;  %p242_p4 = scmp.eq.s32.totalorder %s2373_s14, 1 }
   0xa   : > { %s2720_s18 = scalar_select %p223_p1, %s2611_s11, %s225_s16  }
   0xb   : > { %p2722_p5 = por %p236_p2, %p235_p0  ;;  %p2726_p6 = por %p242_p4, %p241_p3 }
   0xc   : > { %3235 = sst [smem:[#allocation11_spill]] %s2720_s18  ;;  %p2374_p7 = scmp.ge.s32.totalorder %s2615_s12, 1 }
   0xd   : > { %s3237_s20 = scalar_select %p2726_p6, 1, 0 }
   0xe   : > { %p249_p8 = scmp.lt.s32.totalorder %s2615_s12, 3  ;;  %p3234_p9 = scmp.eq.s32.totalorder %s2705_s13, 0 }
   0xf   : > { %s2617_s22 = smov [#allocation2]   ;;  %s2618_s25 = smov [#allocation5]  }
  0x10   : > { %p2733_p10 = pnand %p2374_p7, %p249_p8  ;;  %s264_s23 = sshll.u32 %s2617_s22, 4  ;;  %s265_s23 = int_to_ptr.vmem [resolvable:$true] %s264_s23 }
  0x11   : > { %s277_s26 = sshll.u32 %s2618_s25, 4  ;;  %s2506_s27 = scalar_lea.vmem %s265_s23, 288  ;;  %s278_s26 = int_to_ptr.vmem [resolvable:$true] %s277_s26 }
  0x12   : > { %p2429_p11 = pneg %p2733_p10  ;;  %p2507_p0 = scmp.ne.s32.totalorder %s265_s23, %s2506_s27 }
  0x13   : > { %p2514_p3 = scmp.lt.s32.totalorder %s265_s23, %s265_s23  ;;  %p2515_p4 = scmp.lt.s32.totalorder %s2506_s27, %s2506_s27 }
  0x14   : > { %p2741_p12 = pnand %p3234_p9, %p2429_p11 }
  0x15   : > { %p2516_p7 = por %p2515_p4, %p2514_p3 }
  0x16   : > { %p2497_p13 = pneg %p2741_p12 }
  0x18   : > { %p2509_p1 = pnand %p2507_p0, %p2497_p13 }
  0x1a   : > { %p2510_p2 = pneg %p2509_p1 }
  0x1c   : > { %p2517_p8 = pnand %p2516_p7, %p2510_p2 }
  0x1e   : > { %2520 = shalt.err (!%p2517_p8)
}
  0x1f   : > { %s2619_s28 = smov 32   ;;  %s2620_s29 = smov 2  }
  0x20   : > { %2432 = dma.hbm_to_vmem [thread:$0]  (!%p2741_p12), %s3226_s2, 288, %s265_s23, [#allocation3], %s2619_s28, %s2619_s28, %s2620_s29  }
  0x21   : > { %s2532_s17 = scalar_lea.vmem %s278_s26, 1152  ;;  %p2540_p9 = scmp.lt.s32.totalorder %s278_s26, %s278_s26 }
  0x22   : > { %p2533_p11 = scmp.ne.s32.totalorder %s278_s26, %s2532_s17  ;;  %p2541_p6 = scmp.lt.s32.totalorder %s2532_s17, %s2532_s17 }
  0x24   : > { %p2535_p0 = pnand %p2533_p11, %p2497_p13  ;;  %p2542_p3 = por %p2541_p6, %p2540_p9 }
  0x26   : > { %p2536_p1 = pneg %p2535_p0 }
  0x28   : > { %p2543_p2 = pnand %p2542_p3, %p2536_p1 }
  0x2a   : > { %2546 = shalt.err (!%p2543_p2)
}
  0x2b   : > { %s2621_s22 = smov 128   ;;  %s2622_s25 = smov 8  }
  0x2c   : > { %2435 = dma.hbm_to_vmem [thread:$0]  (!%p2741_p12), %s3227_s3, 1152, %s278_s26, [#allocation6], %s2621_s22, %s2621_s22, %s2622_s25  }
  0x2d   : > { %316 = sbr.rel (%p2733_p10) target bundleno = 1010 (0x3f2), region = 56  ;;  %p3240_p4 = scmp.eq.s32.totalorder (!%p2733_p10), %s2705_s13, 0 }
  0x32   : > { %2590 = dma.done.wait (%p3240_p4), [#allocation3], 288   ;;  %p3241_p13 = pmov %p3240_p4 }
  0x33   : > { %p3242_p6 = pmov %p3240_p4 }
  0x34   : > { %2592 = vsyncadd (%p3241_p13), [#allocation3], 4294967008 }
  0x35   : > { %2594 = dma.done.wait (%p3242_p6), [#allocation6], 1152   ;;  %p3243_p9 = pmov %p3240_p4 }
  0x36   : > { %v2623_v0 = vmov 0.0   ;;  %v378_v1 = vld [vmem:[%s3225_s1 + $0x78] sm:$0xff]  ;;  %v377_v2 = vld [vmem:[%s3225_s1 + $0x70] sm:$0xff]  ;;  %v376_v3 = vld [vmem:[%s3225_s1 + $0x68] sm:$0xff]  ;;  %p356_p10 = scmp.lt.s32.totalorder %s2705_s13, 1  ;;  %vm379_vm0 = vcmask 523264   ;;  %v488_v38 = vlaneseq }
  0x37   : > { %2596 = vsyncadd (%p3243_p9), [#allocation6], 4294966144  ;;  %450 = vmatprep.mubr.f32.mxu0 %v2623_v0  ;;  %608 = vmatprep.mubr.f32.mxu1 %v2623_v0  ;;  %v375_v4 = vld [vmem:[%s3225_s1 + $0x60] sm:$0xff]  ;;  %v374_v5 = vld [vmem:[%s3225_s1 + $0x58] sm:$0xff]  ;;  %s2625_s27 = smov 16   ;;  %s2626_s18 = smov 113  }
  0x38   : > { %402 = vmatprep.subr.mxu0 %v378_v1  ;;  %v373_v6 = vld [vmem:[%s3225_s1 + $0x50] sm:$0xff]  ;;  %v372_v7 = vld [vmem:[%s3225_s1 + $0x48] sm:$0xff]  ;;  %s357_s21 = scalar_select %p356_p10, %s2705_s13, 1  ;;  %v371_v8 = vld [vmem:[%s3225_s1 + $0x40] sm:$0xff]  ;;  %v2631_v23 = vmov 0   ;;  %v489_v41 = vshrl.u32 %v488_v38, 7 }
  0x39   : > { %403 = vmatpush1.msra.mxu0 %v377_v2  ;;  %v370_v9 = vld [vmem:[%s3225_s1 + $0x38] sm:$0xff]  ;;  %v369_v10 = vld [vmem:[%s3225_s1 + $0x30] sm:$0xff]  ;;  %v368_v11 = vld [vmem:[%s3225_s1 + $0x28] sm:$0xff]  ;;  %s2627_s23 = smov 17   ;;  %s2628_s24 = smov 15   ;;  %2493 = vset.pattern.permute.xlu0 %v2631_v23  ;;  %vm513_vm1 = vcmask 130048  }
  0x3a   : > { %404 = vmatprep.subr.mxu0 %v376_v3  ;;  %s2417_s22 = sshll.u32 %s357_s21, 4  ;;  %v367_v12 = vld [vmem:[%s3225_s1 + $0x20] sm:$0xff]  ;;  %v366_v13 = vld [vmem:[%s3225_s1 + $0x18] sm:$0xff]  ;;  %v365_v14 = vld [vmem:[%s3225_s1 + $0x10] sm:$0xff]  ;;  %s2629_s26 = smov 1   ;;  %2494 = vset.pattern.permute.xlu1 %v2631_v23  ;;  %v2924_v45 = vsub.s32 0, %v489_v41 }
  0x3b   : > { %405 = vmatpush1.msra.mxu0 %v375_v4  ;;  %s360_s14 = scalar_lea.vmem %s3224_s0, %s2417_s22  ;;  %v364_v15 = vld [vmem:[%s3225_s1 + $0x8] sm:$0xff]  ;;  %v363_v16 = vld [vmem:[%s3225_s1] sm:$0xff]  ;;  %s2624_s22 = smov 127   ;;  %v2926_v46 = vsub.s32 1, %v489_v41  ;;  %vm477_vm2 = vcmask 138240   ;;  %vm699_vm3 = vcmask 121856  }
  0x3c   : > { %406 = vmatprep.subr.mxu0 %v374_v5  ;;  %v361_v17 = vld [vmem:[%s360_s14] sm:$0xff]  ;;  %v362_v18 = vld [vmem:[%s360_s14 + $0x8] sm:$0xff]  ;;  %s2630_s28 = smov 112   ;;  %s2632_s29 = smov 111   ;;  %vm813_vm4 = vcmask 7168   ;;  %vm1003_vm5 = vcmask 1039360  }
  0x3d   : > { %407 = vmatpush1.msra.mxu0 %v373_v6  ;;  %v1451_v24 = vld [vmem:[%s3228_s4] sm:$0xff]  ;;  %vm1231_vm6 = vcmask 916480   ;;  %vm1117_vm7 = vcmask 924672   ;;  %vm1345_vm8 = vcmask 908288   ;;  %vm1496_vm9 = vcmask 64512   ;;  %s353_s14 = sand.u32 1, %s2607_s10  }
  0x3e   : > { %408 = vmatprep.subr.mxu0 %v372_v7  ;;  %v1459_v25 = vld [vmem:[%s3229_s5] sm:$0xff]  ;;  %s2381_s21 = sshll.u32 %s353_s14, 4  ;;  %s2418_s16 = sshll.u32 %s2705_s13, 8 }
  0x3f   : > { %409 = vmatpush1.msra.mxu0 %v371_v8  ;;  %v523_v44 = vld [vmem:[#allocation2 + $0x2] sm:$0x3]  ;;  %v486_v47 = vld [vmem:[#allocation2] sm:$0x3]  ;;  %v709_v61 = vld [vmem:[#allocation2 + $0x4] sm:$0x3] }
  0x40   : > { %410 = vmatprep.subr.mxu0 %v370_v9  ;;  %v2929_v48 = vrot.slane %v523_v44, %v2924_v45  ;;  %v2932_v49 = vrot.slane %v523_v44, %v2926_v46  ;;  %v2941_v58 = vrot.slane %v486_v47, %v2924_v45  ;;  %v2944_v59 = vrot.slane %v486_v47, %v2926_v46  ;;  %v540_v6 = vld [vmem:[#allocation5 + $0x8] sm:$0xff]  ;;  %s355_s17 = scalar_lea.vmem [#allocation7], %s2381_s21 }
  0x41   : > { %411 = vmatpush1.msra.mxu0 %v369_v10  ;;  %v2955_v9 = vrot.slane %v709_v61, %v2924_v45  ;;  %v2958_v10 = vrot.slane %v709_v61, %v2926_v46  ;;  %s2292_s25 = sshll.u32 %s355_s17, 4  ;;  %s2293_s25 = int_to_ptr.vmem [resolvable:$true] %s2292_s25 }
  0x42   : > { %412 = vmatprep.subr.mxu0 %v368_v11  ;;  %v823_v11 = vld [vmem:[#allocation2 + $0x6] sm:$0x3] }
  0x43   : > { %413 = vmatpush1.msra.mxu0 %v367_v12 }
  0x44   : > { %414 = vmatprep.subr.mxu0 %v366_v13 }
  0x45   : > { %415 = vmatpush1.msra.mxu0 %v365_v14 }
  0x46   : > { %416 = vmatprep.subr.mxu0 %v364_v15  ;;  %v1015_v15 = vld [vmem:[#allocation2 + $0xa] sm:$0x3] }
  0x47   : > { %417 = vmatpush1.msra.mxu0 %v363_v16 }
  0x48   : > { %2384 = vmatmul.mubr.msk.f32.vlgmr.msra.gmra.mxu0 %vm379_vm0, %v361_v17 }
  0x49   : > { %456 = vmatprep.mubr.f32.mxu0 %v2623_v0 }
  0x4c   : > { %2385 = vmatmul.mubr.msk.f32.gmra.mxu0 %vm379_vm0, %v362_v18 }
  0x4d   : > { %1100 = vmatprep.mubr.f32.mxu0 %v2623_v0 }
 0x108   : > { %v2830_v19 = vpop.f32.mrf.mxu0 }
 0x109   : > { %995 = vrot.lane.b32.xlu0 %v2830_v19, %s2624_s22  ;;  %509 = vrot.lane.b32.xlu1 %v2830_v19, %s2625_s27 }
 0x10a   : > { %v2840_v20 = vpop.f32.mrf.mxu0 }
 0x10c   : > { %v2854_v21 = vpop.f32.mrf.mxu0 }
 0x10d   : > { %1109 = vrot.lane.b32.xlu0 %v2830_v19, %s2626_s18  ;;  %473 = vrot.lane.b32.xlu1 %v2830_v19, %s2627_s23 }
 0x10e   : > { %v2868_v22 = vpop.f32.mrf.mxu0 }
 0x111   : > { %695 = vrot.lane.b32.xlu1 %v2830_v19, %s2628_s24  ;;  %465 = vrot.lane.b32.xlu0 %v2840_v20, %s2627_s23 }
 0x115   : > { %809 = vrot.lane.b32.xlu1 %v2830_v19, %s2629_s26  ;;  %689 = vrot.lane.b32.xlu0 %v2840_v20, %s2628_s24 }
 0x119   : > { %803 = vrot.lane.b32.xlu0 %v2840_v20, %s2629_s26  ;;  %503 = vrot.lane.b32.xlu1 %v2840_v20, %s2625_s27 }
 0x11d   : > { %997 = vrot.lane.b32.xlu1 %v2840_v20, %s2624_s22  ;;  %511 = vrot.lane.b32.xlu0 %v2854_v21, %s2625_s27 }
 0x121   : > { %1111 = vrot.lane.b32.xlu1 %v2840_v20, %s2626_s18  ;;  %999 = vrot.lane.b32.xlu0 %v2854_v21, %s2624_s22 }
 0x125   : > { %475 = vrot.lane.b32.xlu1 %v2854_v21, %s2627_s23  ;;  %1113 = vrot.lane.b32.xlu0 %v2854_v21, %s2626_s18 }
 0x129   : > { %697 = vrot.lane.b32.xlu1 %v2854_v21, %s2628_s24  ;;  %505 = vrot.lane.b32.xlu0 %v2868_v22, %s2625_s27 }
 0x12d   : > { %811 = vrot.lane.b32.xlu1 %v2854_v21, %s2629_s26  ;;  %467 = vrot.lane.b32.xlu0 %v2868_v22, %s2627_s23 }
 0x131   : > { %1225 = vrot.lane.b32.xlu1 %v2840_v20, %s2630_s28  ;;  %691 = vrot.lane.b32.xlu0 %v2868_v22, %s2628_s24 }
 0x135   : > { %1001 = vrot.lane.b32.xlu1 %v2868_v22, %s2624_s22  ;;  %805 = vrot.lane.b32.xlu0 %v2868_v22, %s2629_s26 }
 0x139   : > { %1115 = vrot.lane.b32.xlu1 %v2868_v22, %s2626_s18  ;;  %1227 = vrot.lane.b32.xlu0 %v2854_v21, %s2630_s28 }
 0x13d   : > { %1229 = vrot.lane.b32.xlu1 %v2868_v22, %s2630_s28  ;;  %1223 = vrot.lane.b32.xlu0 %v2830_v19, %s2630_s28 }
 0x141   : > { %1343 = vrot.lane.b32.xlu1 %v2868_v22, %s2632_s29  ;;  %1341 = vrot.lane.b32.xlu0 %v2854_v21, %s2632_s29 }
 0x145   : > { %1339 = vrot.lane.b32.xlu1 %v2840_v20, %s2632_s29  ;;  %1337 = vrot.lane.b32.xlu0 %v2830_v19, %s2632_s29 }
 0x149   : > { %1454 = vperm.xlu0 %2493, %v1451_v24   ;;  %1462 = vperm.xlu1 %2494, %v1459_v25   ;;  %v502_v25 = vld [vmem:[#allocation5] sm:$0xff] }
 0x17b   : > { %v2908_v26 = vpop.permute.xlu0 %995  ;;  %v510_v27 = vpop.permute.xlu1 %509 }
 0x17f   : > { %v2910_v28 = vpop.permute.xlu0 %1109  ;;  %v474_v29 = vpop.permute.xlu1 %473 }
 0x183   : > { %v696_v30 = vpop.permute.xlu1 %695  ;;  %v466_v31 = vpop.permute.xlu0 %465 }
 0x184   : > { %v478_v60 = vsel %vm477_vm2, %v474_v29, %v466_v31  ;;  %v484_v2 = vsel %vm477_vm2, %v466_v31, %v474_v29 }
 0x185   : > { %v498_v12 = vmul.f32 %v2941_v58, %v484_v2  ;;  %v499_v13 = vmul.f32 %v2944_v59, %v478_v60 }
 0x187   : > { %v2912_v32 = vpop.permute.xlu1 %809  ;;  %v690_v33 = vpop.permute.xlu0 %689 }
 0x188   : > { %v706_v14 = vsel %vm699_vm3, %v690_v33, %v696_v30  ;;  %v700_v18 = vsel %vm699_vm3, %v696_v30, %v690_v33  ;;  %v2977_v30 = vrot.slane %v823_v11, %v2926_v46  ;;  %v2980_v33 = vrot.slane %v1015_v15, %v2924_v45 }
 0x189   : > { %v722_v38 = vmul.f32 %v2958_v10, %v700_v18 }
 0x18b   : > { %v2914_v34 = vpop.permute.xlu0 %803  ;;  %v504_v35 = vpop.permute.xlu1 %503 }
 0x18c   : > { %v514_v52 = vsel %vm513_vm1, %v510_v27, %v504_v35  ;;  %v520_v55 = vsel %vm513_vm1, %v504_v35, %v510_v27  ;;  %v2971_v27 = vrot.slane %v823_v11, %v2924_v45  ;;  %v721_v35 = vmul.f32 %v2955_v9, %v706_v14 }
 0x18d   : > { %v536_v62 = vmul.f32 %v2932_v49, %v514_v52  ;;  %v535_v3 = vmul.f32 %v2929_v48, %v520_v55  ;;  %v814_v41 = vsel %vm813_vm4, %v2912_v32, %v2914_v34  ;;  %v820_v61 = vsel %vm813_vm4, %v2914_v34, %v2912_v32  ;;  %v1357_v32 = vld [vmem:[#allocation2 + $0x10] sm:$0x3] }
 0x18e   : > { %v835_v34 = vmul.f32 %v2971_v27, %v820_v61  ;;  %v3031_v14 = vrot.slane %v1357_v32, %v2924_v45 }
 0x18f   : > { %v2916_v36 = vpop.permute.xlu1 %997  ;;  %v512_v37 = vpop.permute.xlu0 %511 }
 0x193   : > { %v2918_v39 = vpop.permute.xlu1 %1111  ;;  %v2920_v40 = vpop.permute.xlu0 %999 }
 0x197   : > { %v476_v42 = vpop.permute.xlu1 %475  ;;  %v2922_v43 = vpop.permute.xlu0 %1113 }
 0x19b   : > { %v698_v50 = vpop.permute.xlu1 %697  ;;  %v506_v51 = vpop.permute.xlu0 %505 }
 0x19c   : > { %v521_v53 = vsel %vm513_vm1, %v506_v51, %v512_v37  ;;  %v515_v54 = vsel %vm513_vm1, %v512_v37, %v506_v51  ;;  %v2983_v37 = vrot.slane %v1015_v15, %v2926_v46 }
 0x19d   : > { %v538_v56 = vmul.f32 %v2932_v49, %v515_v54  ;;  %v537_v57 = vmul.f32 %v2929_v48, %v521_v53  ;;  %v726_v54 = vld [vmem:[#allocation5 + $0x10] sm:$0xff] }
 0x19f   : > { %v812_v63 = vpop.permute.xlu1 %811  ;;  %572 = vmatprep.subr.mxu1 %v538_v56  ;;  %v468_v1 = vpop.permute.xlu0 %467 }
 0x1a0   : > { %v479_v4 = vsel %vm477_vm2, %v476_v42, %v468_v1  ;;  %v485_v5 = vsel %vm477_vm2, %v468_v1, %v476_v42  ;;  %573 = vmatpush1.msra.mxu1 %v537_v57  ;;  %v1012_v42 = vsel %vm1003_vm5, %v2916_v36, %v2908_v26  ;;  %v1129_v1 = vld [vmem:[#allocation2 + $0xc] sm:$0x3] }
 0x1a1   : > { %v500_v7 = vmul.f32 %v2941_v58, %v485_v5  ;;  %v501_v8 = vmul.f32 %v2944_v59, %v479_v4  ;;  %574 = vmatprep.subr.mxu1 %v536_v62  ;;  %v1243_v62 = vld [vmem:[#allocation2 + $0xe] sm:$0x3]  ;;  %v836_v4 = vmul.f32 %v2977_v30, %v814_v41 }
 0x1a2   : > { %575 = vmatpush1.msra.mxu1 %v535_v3  ;;  %v840_v5 = vld [vmem:[#allocation5 + $0x18] sm:$0xff] }
 0x1a3   : > { %v2963_v16 = vpop.permute.xlu1 %1225  ;;  %2386 = vmatmul.mubr.msk.f32.vlgmr.msra.gmra.mxu1 %vm513_vm1, %v540_v6  ;;  %646 = vmatprep.subr.mxu1 %v501_v8  ;;  %v692_v17 = vpop.permute.xlu0 %691  ;;  %v3019_v6 = vrot.slane %v1129_v1, %v2924_v45  ;;  %v3026_v8 = vrot.slane %v1129_v1, %v2926_v46 }
 0x1a4   : > { %v701_v23 = vsel %vm699_vm3, %v698_v50, %v692_v17  ;;  %v707_v24 = vsel %vm699_vm3, %v692_v17, %v698_v50  ;;  %647 = vmatpush1.msra.mxu1 %v500_v7  ;;  %682 = vmatprep.mubr.f32.mxu1 %v2623_v0  ;;  %v3023_v7 = vrot.slane %v1243_v62, %v2924_v45 }
 0x1a5   : > { %v723_v29 = vmul.f32 %v2955_v9, %v707_v24  ;;  %v724_v31 = vmul.f32 %v2958_v10, %v701_v23  ;;  %648 = vmatprep.subr.mxu1 %v499_v13  ;;  %v1118_v23 = vsel %vm1117_vm7, %v2910_v28, %v2918_v39  ;;  %v1126_v45 = vsel %vm1117_vm7, %v2918_v39, %v2910_v28  ;;  %v1032_v28 = vld [vmem:[#allocation5 + $0x28] sm:$0xff] }
 0x1a6   : > { %649 = vmatpush1.msra.mxu1 %v498_v12 }
 0x1a7   : > { %v1002_v44 = vpop.permute.xlu1 %1001  ;;  %2387 = vmatmul.mubr.msk.f32.vlgmr.msra.gmra.mxu1 %vm513_vm1, %v502_v25  ;;  %758 = vmatprep.subr.mxu1 %v724_v31  ;;  %v806_v47 = vpop.permute.xlu0 %805  ;;  %v3048_v25 = vrot.slane %v1357_v32, %v2926_v46 }
 0x1a8   : > { %v1005_v50 = vsel %vm1003_vm5, %v2920_v40, %v1002_v44  ;;  %v1013_v51 = vsel %vm1003_vm5, %v1002_v44, %v2920_v40  ;;  %v815_v52 = vsel %vm813_vm4, %v812_v63, %v806_v47  ;;  %v821_v53 = vsel %vm813_vm4, %v806_v47, %v812_v63  ;;  %759 = vmatpush1.msra.mxu1 %v723_v29 }
 0x1a9   : > { %v1029_v55 = vmul.f32 %v2980_v33, %v1005_v50  ;;  %v1030_v56 = vmul.f32 %v2983_v37, %v1013_v51  ;;  %v837_v57 = vmul.f32 %v2971_v27, %v821_v53  ;;  %v838_v60 = vmul.f32 %v2977_v30, %v815_v52  ;;  %760 = vmatprep.subr.mxu1 %v722_v38  ;;  %v1146_v50 = vld [vmem:[#allocation5 + $0x30] sm:$0xff] }
 0x1aa   : > { %v1004_v40 = vsel %vm1003_vm5, %v2908_v26, %v2916_v36  ;;  %761 = vmatpush1.msra.mxu1 %v721_v35  ;;  %794 = vmatprep.mubr.f32.mxu1 %v2623_v0  ;;  %v1028_v63 = vmul.f32 %v2983_v37, %v1012_v42  ;;  %v3016_v36 = vrot.slane %v1243_v62, %v2926_v46 }
 0x1ab   : > { %1064 = vmatprep.subr.mxu0 %v1030_v56  ;;  %v1116_v2 = vpop.permute.xlu1 %1115  ;;  %2388 = vmatmul.mubr.msk.f32.vlgmr.msra.gmra.mxu1 %vm513_vm1, %v726_v54  ;;  %v1228_v3 = vpop.permute.xlu0 %1227  ;;  %v1027_v26 = vmul.f32 %v2980_v33, %v1004_v40  ;;  %v1142_v38 = vmul.f32 %v3026_v8, %v1126_v45  ;;  %v1141_v42 = vmul.f32 %v3019_v6, %v1118_v23 }
 0x1ac   : > { %872 = vmatprep.subr.mxu1 %v838_v60  ;;  %1065 = vmatpush1.msra.mxu0 %v1029_v55  ;;  %v1127_v11 = vsel %vm1117_vm7, %v1116_v2, %v2922_v43  ;;  %v1119_v15 = vsel %vm1117_vm7, %v2922_v43, %v1116_v2  ;;  %v918_v43 = vld [vmem:[#allocation5 + $0x20] sm:$0xff]  ;;  %v1260_v55 = vld [vmem:[#allocation5 + $0x38] sm:$0xff] }
 0x1ad   : > { %873 = vmatpush1.msra.mxu1 %v837_v57  ;;  %1066 = vmatprep.subr.mxu0 %v1028_v63  ;;  %v1144_v29 = vmul.f32 %v3026_v8, %v1127_v11  ;;  %v1143_v39 = vmul.f32 %v3019_v6, %v1119_v15  ;;  %v1374_v60 = vld [vmem:[#allocation5 + $0x40] sm:$0xff] }
 0x1ae   : > { %874 = vmatprep.subr.mxu1 %v836_v4  ;;  %908 = vmatprep.mubr.f32.mxu1 %v2623_v0 }
 0x1af   : > { %875 = vmatpush1.msra.mxu1 %v835_v34  ;;  %1067 = vmatpush1.msra.mxu0 %v1027_v26  ;;  %v1230_v12 = vpop.permute.xlu1 %1229  ;;  %v1224_v13 = vpop.permute.xlu0 %1223 }
 0x1b0   : > { %v1233_v17 = vsel %vm1231_vm6, %v1228_v3, %v1230_v12  ;;  %v1241_v18 = vsel %vm1231_vm6, %v1230_v12, %v1228_v3  ;;  %2389 = vmatmul.mubr.msk.f32.vlgmr.msra.gmra.mxu1 %vm513_vm1, %v840_v5  ;;  %950 = vmatprep.subr.mxu1 %v2868_v22  ;;  %v1240_v31 = vsel %vm1231_vm6, %v2963_v16, %v1224_v13 }
 0x1b1   : > { %v1258_v24 = vmul.f32 %v3016_v36, %v1241_v18  ;;  %951 = vmatpush1.msra.mxu1 %v2854_v21  ;;  %v1257_v22 = vmul.f32 %v3023_v7, %v1233_v17  ;;  %986 = vmatprep.mubr.f32.mxu1 %v2623_v0  ;;  %v1232_v21 = vsel %vm1231_vm6, %v1224_v13, %v2963_v16 }
 0x1b2   : > { %952 = vmatprep.subr.mxu1 %v2840_v20  ;;  %v1256_v44 = vmul.f32 %v3016_v36, %v1240_v31  ;;  %2391 = vmatmul.mubr.msk.f32.vlgmr.msra.gmra.mxu0 %vm513_vm1, %v1032_v28 }
 0x1b3   : > { %953 = vmatpush1.msra.mxu1 %v2830_v19  ;;  %v1344_v46 = vpop.permute.xlu1 %1343  ;;  %1292 = vmatprep.subr.mxu0 %v1258_v24  ;;  %v1342_v35 = vpop.permute.xlu0 %1341  ;;  %v1255_v19 = vmul.f32 %v3023_v7, %v1232_v21 }
 0x1b4   : > { %2390 = vmatmul.mubr.msk.f32.vlgmr.msra.gmra.mxu1 %vm513_vm1, %v918_v43  ;;  %1178 = vmatprep.subr.mxu1 %v1144_v29  ;;  %v1347_v20 = vsel %vm1345_vm8, %v1342_v35, %v1344_v46  ;;  %v1355_v41 = vsel %vm1345_vm8, %v1344_v46, %v1342_v35 }
 0x1b5   : > { %v1372_v16 = vmul.f32 %v3048_v25, %v1355_v41  ;;  %1179 = vmatpush1.msra.mxu1 %v1143_v39  ;;  %v1371_v47 = vmul.f32 %v3031_v14, %v1347_v20  ;;  %1293 = vmatpush1.msra.mxu0 %v1257_v22 }
 0x1b6   : > { %1180 = vmatprep.subr.mxu1 %v1142_v38  ;;  %1294 = vmatprep.subr.mxu0 %v1256_v44 }
 0x1b7   : > { %1181 = vmatpush1.msra.mxu1 %v1141_v42  ;;  %v1340_v51 = vpop.permute.xlu1 %1339  ;;  %v1338_v52 = vpop.permute.xlu0 %1337  ;;  %1214 = vmatprep.mubr.f32.mxu1 %v2623_v0 }
 0x1b8   : > { %1295 = vmatpush1.msra.mxu0 %v1255_v19  ;;  %v1346_v53 = vsel %vm1345_vm8, %v1338_v52, %v1340_v51  ;;  %v1354_v54 = vsel %vm1345_vm8, %v1340_v51, %v1338_v52  ;;  %2392 = vmatmul.mubr.msk.f32.vlgmr.msra.gmra.mxu1 %vm513_vm1, %v1146_v50 }
 0x1b9   : > { %1406 = vmatprep.subr.mxu1 %v1372_v16  ;;  %v1369_v56 = vmul.f32 %v3031_v14, %v1346_v53  ;;  %v1370_v57 = vmul.f32 %v3048_v25, %v1354_v54  ;;  %1328 = vmatprep.mubr.f32.mxu0 %v2623_v0  ;;  %v2257_v54 = vld [vmem:[%s3231_s7] sm:$0xff] }
 0x1ba   : > { %1407 = vmatpush1.msra.mxu1 %v1371_v47  ;;  %2393 = vmatmul.mubr.msk.f32.vlgmr.msra.gmra.mxu0 %vm513_vm1, %v1260_v55  ;;  %v2265_v55 = vld [vmem:[%s3232_s8] sm:$0xff] }
 0x1bb   : > { %1408 = vmatprep.subr.mxu1 %v1370_v57  ;;  %1442 = vmatprep.mubr.f32.mxu1 %v2623_v0 }
 0x1bc   : > { %1409 = vmatpush1.msra.mxu1 %v1369_v56  ;;  %1564 = vmatprep.mubr.f32.mxu0 %v2623_v0 }
 0x1bd   : > { %2394 = vmatmul.mubr.msk.f32.vlgmr.msra.gmra.mxu1 %vm513_vm1, %v1374_v60 }
 0x1be   : > { %1638 = vmatprep.mubr.f32.mxu1 %v2623_v0 }
 0x1c4   : > { %v1455_v46 = vpop.permute.xlu0 %1454  ;;  %v1463_v44 = vpop.permute.xlu1 %1462 }
 0x263   : > { %v610_v61 = vpop.f32.mrf.mxu1 }
 0x265   : > { %v612_v40 = vpop.f32.mrf.mxu1 }
 0x267   : > { %v684_v62 = vpop.f32.mrf.mxu1 }
 0x268   : > { %v685_v3 = vadd.f32 %v684_v62, %v610_v61 }
 0x269   : > { %v686_v63 = vpop.f32.mrf.mxu1 }
 0x26a   : > { %v687_v32 = vadd.f32 %v686_v63, %v612_v40 }
 0x26b   : > { %v796_v1 = vpop.f32.mrf.mxu1 }
 0x26c   : > { %v801_v34 = vadd.f32 %v796_v1, %v685_v3 }
 0x26d   : > { %v798_v2 = vpop.f32.mrf.mxu1 }
 0x26e   : > { %v802_v5 = vadd.f32 %v798_v2, %v687_v32  ;;  %v2395_v2 = vld [vmem:[%s3230_s6 + $0x8] sm:$0xff] }
 0x270   : > { %v910_v4 = vpop.f32.mrf.mxu1 }
 0x271   : > { %v915_v11 = vadd.f32 %v910_v4, %v801_v34 }
 0x272   : > { %v912_v26 = vpop.f32.mrf.mxu1  ;;  %v1102_v17 = vpop.f32.mrf.mxu0 }
 0x273   : > { %v916_v13 = vadd.f32 %v912_v26, %v802_v5 }
 0x274   : > { %v988_v12 = vpop.f32.mrf.mxu1  ;;  %v1104_v24 = vpop.f32.mrf.mxu0 }
 0x275   : > { %v993_v15 = vadd.f32 %v988_v12, %v915_v11 }
 0x276   : > { %v990_v18 = vpop.f32.mrf.mxu1 }
 0x277   : > { %v994_v23 = vadd.f32 %v990_v18, %v916_v13  ;;  %v1107_v45 = vadd.f32 %v1102_v17, %v993_v15  ;;  %v2398_v18 = vld [vmem:[%s3230_s6 + $0x10] sm:$0xff] }
 0x278   : > { %v1216_v29 = vpop.f32.mrf.mxu1 }
 0x279   : > { %v1108_v43 = vadd.f32 %v1104_v24, %v994_v23  ;;  %v1221_v22 = vadd.f32 %v1216_v29, %v1107_v45  ;;  %v2400_v29 = vld [vmem:[%s3230_s6 + $0x18] sm:$0xff] }
 0x27a   : > { %v1218_v31 = vpop.f32.mrf.mxu1  ;;  %v1330_v28 = vpop.f32.mrf.mxu0 }
 0x27b   : > { %v1222_v39 = vadd.f32 %v1218_v31, %v1108_v43  ;;  %v1335_v21 = vadd.f32 %v1330_v28, %v1221_v22 }
 0x27c   : > { %v1332_v35 = vpop.f32.mrf.mxu0 }
 0x27d   : > { %v1444_v38 = vpop.f32.mrf.mxu1  ;;  %v1336_v20 = vadd.f32 %v1332_v35, %v1222_v39 }
 0x27e   : > { %v1449_v41 = vadd.f32 %v1444_v38, %v1335_v21 }
 0x27f   : > { %v1446_v42 = vpop.f32.mrf.mxu1 }
 0x280   : > { %v1450_v16 = vadd.f32 %v1446_v42, %v1336_v20  ;;  %v1457_v19 = vmul.f32 %v1455_v46, %v1449_v41 }
 0x282   : > { %v1458_v47 = vmul.f32 %v1455_v46, %v1450_v16  ;;  %v1465_v50 = vadd.f32 %v1463_v44, %v1457_v19 }
 0x284   : > { %v1466_v51 = vadd.f32 %v1463_v44, %v1458_v47  ;;  %v3082_v52 = vmax.f32 %v1465_v50, 0.0  ;;  %v2408_v44 = vld [vmem:[%s3230_s6 + $0x38] sm:$0xff] }
 0x286   : > { %1901 = vrot.lane.b32.xlu1 %v3082_v52, %s2624_s22  ;;  %1486 = vrot.lane.b32.xlu0 %v3082_v52, %s2625_s27  ;;  %v1468_v53 = vmax.f32 %v1466_v51, 0.0  ;;  %v2410_v51 = vld [vmem:[%s3230_s6 + $0x40] sm:$0xff] }
 0x28a   : > { %1483 = vrot.lane.b32.xlu1 %v1468_v53, %s2625_s27  ;;  %1474 = vrot.lane.b32.xlu0 %v3082_v52, %s2627_s23 }
 0x28e   : > { %1470 = vrot.lane.b32.xlu1 %v1468_v53, %s2627_s23  ;;  %1648 = vrot.lane.b32.xlu0 %v3082_v52, %s2628_s24  ;;  %s2290_s23 = scalar_lea.hbm %s3233_s9, %s2418_s16 }
 0x292   : > { %1645 = vrot.lane.b32.xlu1 %v1468_v53, %s2628_s24  ;;  %1737 = vrot.lane.b32.xlu0 %v3082_v52, %s2629_s26  ;;  %s2547_s24 = scalar_lea.vmem %s2293_s25, 256 }
 0x293   : > { %p2548_p12 = scmp.ne.s32.totalorder %s2293_s25, %s2547_s24 }
 0x295   : > { %p2549_p7 = pnand %p2548_p12, %p2722_p5 }
 0x296   : > { %1734 = vrot.lane.b32.xlu1 %v1468_v53, %s2629_s26  ;;  %1903 = vrot.lane.b32.xlu0 %v1468_v53, %s2624_s22  ;;  %s2633_s26 = smov [#allocation7]  }
 0x297   : > { %p2550_p8 = pneg %p2549_p7  ;;  %s2551_s13 = sshll.u32 %s2633_s26, 4  ;;  %s2552_s13 = int_to_ptr.vmem [resolvable:$false] %s2551_s13 }
 0x298   : > { %p2554_p11 = scmp.lt.s32.totalorder %s2293_s25, %s2552_s13 }
 0x29a   : > { %1990 = vrot.lane.b32.xlu1 %v3082_v52, %s2626_s18  ;;  %1992 = vrot.lane.b32.xlu0 %v1468_v53, %s2626_s18  ;;  %s2278_s18 = scalar_lea.sflag [#allocation4], %s353_s14 }
 0x29e   : > { %2079 = vrot.lane.b32.xlu1 %v3082_v52, %s2630_s28  ;;  %2081 = vrot.lane.b32.xlu0 %v1468_v53, %s2630_s28  ;;  %s2553_s28 = scalar_lea.vmem %s2552_s13, 512 }
 0x29f   : > { %p2555_p0 = scmp.lt.s32.totalorder %s2553_s28, %s2547_s24 }
 0x2a1   : > { %p2556_p1 = por %p2555_p0, %p2554_p11 }
 0x2a2   : > { %2168 = vrot.lane.b32.xlu1 %v3082_v52, %s2632_s29  ;;  %2170 = vrot.lane.b32.xlu0 %v1468_v53, %s2632_s29 }
 0x2a3   : > { %p2557_p3 = pnand %p2556_p1, %p2550_p8 }
 0x2a6   : > { %2260 = vperm.xlu1 %2494, %v2257_v54   ;;  %2268 = vperm.xlu0 %2493, %v2265_v55  }
 0x2f8   : > { %v1902_v56 = vpop.permute.xlu1 %1901  ;;  %v1487_v57 = vpop.permute.xlu0 %1486 }
 0x2fc   : > { %v1484_v60 = vpop.permute.xlu1 %1483  ;;  %v1475_v61 = vpop.permute.xlu0 %1474 }
 0x2fd   : > { %v1488_v40 = vsel %vm513_vm1, %v1487_v57, %v1484_v60  ;;  %v1491_v62 = vsel %vm513_vm1, %v1484_v60, %v1487_v57 }
 0x2fe   : > { %v1492_v63 = vmul.f32 %v1491_v62, %v2929_v48  ;;  %v1493_v1 = vmul.f32 %v1488_v40, %v2932_v49  ;;  %v1482_v48 = vld [vmem:[%s3230_s6] sm:$0xff] }
 0x300   : > { %v1471_v3 = vpop.permute.xlu1 %1470  ;;  %1530 = vmatprep.subr.mxu0 %v1493_v1  ;;  %v1649_v4 = vpop.permute.xlu0 %1648 }
 0x301   : > { %v1476_v32 = vsel %vm477_vm2, %v1475_v61, %v1471_v3  ;;  %v1479_v34 = vsel %vm477_vm2, %v1471_v3, %v1475_v61  ;;  %1531 = vmatpush1.msra.mxu0 %v1492_v63 }
 0x302   : > { %v1480_v26 = vmul.f32 %v1479_v34, %v2941_v58  ;;  %v1481_v5 = vmul.f32 %v1476_v32, %v2944_v59  ;;  %2396 = vmatmul.mubr.msk.f32.vlgmr.msra.gmra.mxu0 %vm1496_vm9, %v2395_v2 }
 0x303   : > { %1725 = vmatprep.mubr.f32.mxu0 %v2623_v0 }
 0x304   : > { %v1646_v49 = vpop.permute.xlu1 %1645  ;;  %1604 = vmatprep.subr.mxu1 %v1481_v5  ;;  %v1738_v11 = vpop.permute.xlu0 %1737 }
 0x305   : > { %v1650_v12 = vsel %vm699_vm3, %v1649_v4, %v1646_v49  ;;  %v1653_v13 = vsel %vm699_vm3, %v1646_v49, %v1649_v4  ;;  %1605 = vmatpush1.msra.mxu1 %v1480_v26 }
 0x306   : > { %v1654_v58 = vmul.f32 %v1653_v13, %v2955_v9  ;;  %v1655_v59 = vmul.f32 %v1650_v12, %v2958_v10  ;;  %2397 = vmatmul.mubr.msk.f32.vlgmr.msra.gmra.mxu1 %vm1496_vm9, %v1482_v48 }
 0x307   : > { %1814 = vmatprep.mubr.f32.mxu1 %v2623_v0 }
 0x308   : > { %v1735_v15 = vpop.permute.xlu1 %1734  ;;  %1691 = vmatprep.subr.mxu0 %v1655_v59  ;;  %v1904_v17 = vpop.permute.xlu0 %1903 }
 0x309   : > { %v1739_v23 = vsel %vm813_vm4, %v1738_v11, %v1735_v15  ;;  %v1742_v45 = vsel %vm813_vm4, %v1735_v15, %v1738_v11  ;;  %v1909_v24 = vsel %vm1003_vm5, %v1904_v17, %v1902_v56  ;;  %1692 = vmatpush1.msra.mxu0 %v1654_v58  ;;  %v1905_v43 = vsel %vm1003_vm5, %v1902_v56, %v1904_v17 }
 0x30a   : > { %v1743_v9 = vmul.f32 %v1742_v45, %v2971_v27  ;;  %v1744_v10 = vmul.f32 %v1739_v23, %v2977_v30  ;;  %1858 = vmatprep.subr.mxu0 %v1468_v53  ;;  %2399 = vmatmul.mubr.msk.f32.vlgmr.msra.gmra.mxu0 %vm1496_vm9, %v2398_v18  ;;  %v1911_v22 = vmul.f32 %v1909_v24, %v2983_v37  ;;  %v2402_v27 = vld [vmem:[%s3230_s6 + $0x20] sm:$0xff] }
 0x30b   : > { %1859 = vmatpush1.msra.mxu0 %v3082_v52  ;;  %v1910_v30 = vmul.f32 %v1905_v43, %v2980_v33  ;;  %1892 = vmatprep.mubr.f32.mxu0 %v2623_v0  ;;  %v2404_v33 = vld [vmem:[%s3230_s6 + $0x28] sm:$0xff] }
 0x30c   : > { %v1991_v31 = vpop.permute.xlu1 %1990  ;;  %1780 = vmatprep.subr.mxu1 %v1744_v10  ;;  %v1993_v28 = vpop.permute.xlu0 %1992 }
 0x30d   : > { %v1994_v39 = vsel %vm1117_vm7, %v1991_v31, %v1993_v28  ;;  %v1998_v21 = vsel %vm1117_vm7, %v1993_v28, %v1991_v31  ;;  %1781 = vmatpush1.msra.mxu1 %v1743_v9 }
 0x30e   : > { %v1999_v37 = vmul.f32 %v1994_v39, %v3019_v6  ;;  %v2000_v46 = vmul.f32 %v1998_v21, %v3026_v8  ;;  %1947 = vmatprep.subr.mxu1 %v1911_v22  ;;  %2401 = vmatmul.mubr.msk.f32.vlgmr.msra.gmra.mxu1 %vm1496_vm9, %v2400_v29  ;;  %v2406_v6 = vld [vmem:[%s3230_s6 + $0x30] sm:$0xff] }
 0x30f   : > { %1948 = vmatpush1.msra.mxu1 %v1910_v30  ;;  %2403 = vmatmul.mubr.msk.f32.vlgmr.msra.gmra.mxu0 %vm1496_vm9, %v2402_v27 }
 0x310   : > { %v2080_v35 = vpop.permute.xlu1 %2079  ;;  %2036 = vmatprep.subr.mxu0 %v2000_v46  ;;  %v2082_v38 = vpop.permute.xlu0 %2081  ;;  %1981 = vmatprep.mubr.f32.mxu1 %v2623_v0 }
 0x311   : > { %v2083_v8 = vsel %vm1231_vm6, %v2080_v35, %v2082_v38  ;;  %v2087_v20 = vsel %vm1231_vm6, %v2082_v38, %v2080_v35  ;;  %2037 = vmatpush1.msra.mxu0 %v1999_v37  ;;  %2070 = vmatprep.mubr.f32.mxu0 %v2623_v0 }
 0x312   : > { %v2088_v41 = vmul.f32 %v2083_v8, %v3023_v7  ;;  %v2089_v42 = vmul.f32 %v2087_v20, %v3016_v36  ;;  %2405 = vmatmul.mubr.msk.f32.vlgmr.msra.gmra.mxu1 %vm1496_vm9, %v2404_v33 }
 0x313   : > { %2407 = vmatmul.mubr.msk.f32.vlgmr.msra.gmra.mxu0 %vm1496_vm9, %v2406_v6  ;;  %2159 = vmatprep.mubr.f32.mxu1 %v2623_v0 }
 0x314   : > { %v2169_v16 = vpop.permute.xlu1 %2168  ;;  %2125 = vmatprep.subr.mxu1 %v2089_v42  ;;  %v2171_v19 = vpop.permute.xlu0 %2170  ;;  %2248 = vmatprep.mubr.f32.mxu0 %v2623_v0 }
 0x315   : > { %v2172_v47 = vsel %vm1345_vm8, %v2169_v16, %v2171_v19  ;;  %v2176_v7 = vsel %vm1345_vm8, %v2171_v19, %v2169_v16  ;;  %2126 = vmatpush1.msra.mxu1 %v2088_v41 }
 0x316   : > { %v2177_v36 = vmul.f32 %v2172_v47, %v3031_v14  ;;  %v2178_v50 = vmul.f32 %v2176_v7, %v3048_v25  ;;  %2409 = vmatmul.mubr.msk.f32.vlgmr.msra.gmra.mxu1 %vm1496_vm9, %v2408_v44 }
 0x318   : > { %2214 = vmatprep.subr.mxu0 %v2178_v50 }
 0x319   : > { %2215 = vmatpush1.msra.mxu0 %v2177_v36 }
 0x31a   : > { %2411 = vmatmul.mubr.msk.f32.vlgmr.msra.gmra.mxu0 %vm1496_vm9, %v2410_v51 }
 0x321   : > { %v2261_v23 = vpop.permute.xlu1 %2260  ;;  %v2269_v10 = vpop.permute.xlu0 %2268 }
 0x3c2   : > { %v1566_v0 = vpop.f32.mrf.mxu0 }
 0x3c4   : > { %v1568_v53 = vpop.f32.mrf.mxu0 }
 0x3c6   : > { %v1640_v52 = vpop.f32.mrf.mxu1 }
 0x3c7   : > { %v1641_v54 = vadd.f32 %v1640_v52, %v1566_v0 }
 0x3c8   : > { %v1642_v55 = vpop.f32.mrf.mxu1 }
 0x3c9   : > { %v1643_v56 = vadd.f32 %v1642_v55, %v1568_v53 }
 0x3ca   : > { %v1727_v57 = vpop.f32.mrf.mxu0 }
 0x3cb   : > { %v1732_v14 = vadd.f32 %v1727_v57, %v1641_v54 }
 0x3cc   : > { %v1729_v60 = vpop.f32.mrf.mxu0 }
 0x3cd   : > { %v1733_v61 = vadd.f32 %v1729_v60, %v1643_v56 }
 0x3ce   : > { %v1816_v25 = vpop.f32.mrf.mxu1 }
 0x3cf   : > { %v1821_v40 = vadd.f32 %v1816_v25, %v1732_v14  ;;  %v1894_v62 = vpop.f32.mrf.mxu0 }
 0x3d0   : > { %v1818_v63 = vpop.f32.mrf.mxu1 }
 0x3d1   : > { %v1822_v1 = vadd.f32 %v1818_v63, %v1733_v61  ;;  %v1899_v2 = vadd.f32 %v1894_v62, %v1821_v40  ;;  %v1896_v3 = vpop.f32.mrf.mxu0 }
 0x3d2   : > { %v1983_v4 = vpop.f32.mrf.mxu1 }
 0x3d3   : > { %v1900_v32 = vadd.f32 %v1896_v3, %v1822_v1  ;;  %v1988_v34 = vadd.f32 %v1983_v4, %v1899_v2  ;;  %v2072_v26 = vpop.f32.mrf.mxu0 }
 0x3d4   : > { %v1985_v5 = vpop.f32.mrf.mxu1 }
 0x3d5   : > { %v1989_v48 = vadd.f32 %v1985_v5, %v1900_v32  ;;  %v2077_v49 = vadd.f32 %v2072_v26, %v1988_v34  ;;  %v2074_v11 = vpop.f32.mrf.mxu0 }
 0x3d6   : > { %v2161_v12 = vpop.f32.mrf.mxu1 }
 0x3d7   : > { %v2078_v13 = vadd.f32 %v2074_v11, %v1989_v48  ;;  %v2166_v59 = vadd.f32 %v2161_v12, %v2077_v49 }
 0x3d8   : > { %v2163_v58 = vpop.f32.mrf.mxu1 }
 0x3d9   : > { %v2167_v17 = vadd.f32 %v2163_v58, %v2078_v13 }
 0x3da   : > { %v2250_v15 = vpop.f32.mrf.mxu0 }
 0x3db   : > { %v2255_v18 = vadd.f32 %v2250_v15, %v2166_v59 }
 0x3dc   : > { %v2252_v45 = vpop.f32.mrf.mxu0 }
 0x3dd   : > { %v2263_v24 = vmul.f32 %v2261_v23, %v2255_v18  ;;  %v2256_v9 = vadd.f32 %v2252_v45, %v2167_v17 }
 0x3df   : > { %v2271_v43 = vadd.f32 %v2269_v10, %v2263_v24  ;;  %v2264_v29 = vmul.f32 %v2261_v23, %v2256_v9 }
 0x3e1   : > { %v2273_v22 = vmax.f32 %v2271_v43, 0.0  ;;  %v2272_v31 = vadd.f32 %v2269_v10, %v2264_v29 }
 0x3e3   : > { %v2274_v28 = vmax.f32 %v2272_v31, 0.0  ;;  %2275 = vst [vmem:[%s355_s17] sm:$0xff] %v2273_v22 }
 0x3e5   : > { %2276 = vst [vmem:[%s355_s17 + $0x8] sm:$0xff] %v2274_v28 }
 0x3e6   : > { %2560 = shalt.err (!%p2557_p3)
}
 0x3e7   : > { %s2561_s29 = scalar_lea.hbm %s2290_s23, 256  ;;  %s2565_s16 = scalar_lea.hbm %s3233_s9, 512 }
 0x3e8   : > { %p2562_p2 = scmp.ne.s32.totalorder %s2290_s23, %s2561_s29  ;;  %p2566_p6 = scmp.lt.s32.totalorder %s2290_s23, %s3233_s9 }
 0x3e9   : > { %p2567_p9 = scmp.lt.s32.totalorder %s2565_s16, %s2561_s29 }
 0x3ea   : > { %p2563_p4 = pnand %p2562_p2, %p2722_p5 }
 0x3eb   : > { %p2568_p10 = por %p2567_p9, %p2566_p6 }
 0x3ec   : > { %p2564_p13 = pneg %p2563_p4 }
 0x3ee   : > { %p2569_p12 = pnand %p2568_p10, %p2564_p13 }
 0x3f0   : > { %2572 = shalt.err (!%p2569_p12)
}
 0x3f1   : > { %2427 = dma.vmem_to_hbm [thread:$0]  (%p2722_p5), %s2293_s25, 256, %s2290_s23, %s2278_s18  }
 0x3f2 PF: > { %p2444_p7 = scmp.ge.s32.totalorder %s2615_s12, 2  ;;  %s2304_s22 = sand.u32 1, %s2603_s30  }
 0x3f3   : > { %p3244_p8 = scmp.ne.s32.totalorder %s3237_s20, 0  ;;  %s2305_s24 = scalar_lea.sflag [#allocation4], %s2304_s22 }
 0x3f5   : > { %p2437_p11 = pnand %p2444_p7, %p3244_p8 }
 0x3f7   : > { %p2438_p0 = pneg %p2437_p11 }
 0x3f9   : > { %2598 = dma.done.wait (%p2438_p0), %s2305_s24, 256  }
 0x3fa   : > { %2600 = vsyncadd (%p2438_p0), %s2305_s24, 4294967040  ;;  %s3245_s26 = sld [smem:[#allocation11_spill]]  ;;  %p21_p1 = scmp.ge.s32.totalorder %s2709_s15, 4  }
 0x3fb   : > { %s3246_s30 = smov %s2607_s10  ;;  %s3247_s10 = smov %s2611_s11 }
 0x3fc   : > { %s3249_s12 = smov %s2709_s15  ;;  %23 = sbr.rel (!%p21_p1) target bundleno = 5 (0x5), region = 123 }
 0x400   : > { %s3248_s11 = smov %s3245_s26 }
 0x401   :  { %2310 = vsyncpa [#allocation3], 1 }
 0x402   :  { %2312 = vsyncpa [#allocation3 + $0x1], 1 }
 0x403   :  { %2313 = vsyncpa [#allocation6], 1 }
 0x404   :  { %2314 = vsyncpa [#allocation4], 1 }
 0x405   :  { %2316 = vsyncpa [#allocation4 + $0x1], 1 }

</bundles_post_ra>
